<compile_context>
chip_gen: v6e
topology: v6e:2x2x1
jax: 0.10.0
libtpu: 0.0.40
codegen_flags: <defaults>
</compile_context>

<pallas_src>
import functools
import math

import jax
import jax.numpy as jnp
import numpy as np
from jax.experimental import pallas as pl
from jax.experimental.pallas import tpu as pltpu


def _nlp_kernel(x_ref, qfold_ref, qbias_ref, qp_ref, weff_ref, beff_ref,
                wfco_ref, bfco_ref, ret_ref, attn_ref, acc_ref,
                *, num_heads, block_b, seeds_padded):
    """One grid step = `block_b` batch elements.

    Shapes seen by the kernel (Bt = block_b, Sp = padded #seeds, S2 = H*Sp):
      x_ref     : (Bt, N, E)   f32   inputs of this batch block (cast to bf16 here)
      qfold_ref : (S2, E)      bf16  folded, pre-scaled query (batch-invariant)
      qbias_ref : (S2, 1)      f32   folded key-path bias (softmax-invariant, kept for parity)
      qp_ref    : (Sp, E)      f32   fc_q(S) residual term (batch-invariant)
      weff_ref  : (H, E, E)    bf16  folded (v in-proj o out-proj) panels
      beff_ref  : (1, E)       f32   folded output bias
      wfco_ref  : (E, E)       bf16  fc_o weight, pre-transposed
      bfco_ref  : (1, E)       f32   fc_o bias
      acc_ref   : (Bt*Sp, E)   f32   VMEM scratch accumulator
    """
    H, Bt, Sp = num_heads, block_b, seeds_padded
    N = x_ref.shape[1]
    E = x_ref.shape[2]
    S2 = H * Sp
    f32, bf16 = jnp.float32, jnp.bfloat16

    x = x_ref[...].astype(bf16)                               # (Bt, N, E)

    # ---- attention scores: contraction over the full embedding E ----------
    qf = jnp.broadcast_to(qfold_ref[...][None], (Bt, S2, E))  # tiny, batch-invariant
    s = jnp.einsum('bse,bne->bsn', qf, x,
                   preferred_element_type=f32)                # (Bt, S2, N)
    s = s + qbias_ref[...]                                    # (S2,1) broadcasts

    # ---- softmax over keys -------------------------------------------------
    m = jnp.max(s, axis=-1, keepdims=True)
    e = jnp.exp(s - m)
    p = e * pl.reciprocal(jnp.sum(e, axis=-1, keepdims=True), approx=True)

    # head-averaged attention weights (H is a major sub-axis of S2)
    attn_ref[...] = jnp.sum(p.reshape(Bt, H, Sp, N), axis=1) * (1.0 / H)

    # ---- attention-weighted key features: u_h = p_h @ X (all heads batched)
    u = jnp.einsum('bsn,bne->bse', p.astype(bf16), x,
                   preferred_element_type=f32)                # (Bt, S2, E)
    u = u.astype(bf16)

    # ---- folded (v in-proj o out-proj): A = sum_h u_h @ Weff_h -------------
    # Full-E contraction, full-E output width; f32 accumulator kept in VMEM
    # scratch to avoid live-value register pressure across heads.
    acc_ref[...] = jnp.dot(u[:, 0:Sp, :].reshape(Bt * Sp, E), weff_ref[0],
                           preferred_element_type=f32)
    for h in range(1, H):
        acc_ref[...] += jnp.dot(u[:, h * Sp:(h + 1) * Sp, :].reshape(Bt * Sp, E),
                                weff_ref[h], preferred_element_type=f32)

    a = acc_ref[...] + beff_ref[...]                          # (Bt*Sp, E)
    o = a.reshape(Bt, Sp, E) + qp_ref[...]                    # O = Q + A
    hid = jnp.dot(o.reshape(Bt * Sp, E).astype(bf16), wfco_ref[...],
                  preferred_element_type=f32) + bfco_ref[...]
    o = o + jnp.maximum(hid, 0.0).reshape(Bt, Sp, E)          # O = O + relu(fc_o(O))
    ret_ref[...] = o


def _pick_block_b(B, N, E, Sp):
    """Largest divisor of B that keeps the per-step working set inside a VMEM
    budget, targets a few hundred rows for the (Bt*Sp, E) GEMMs, and keeps the
    grid >= 2 steps when possible (v7x has 2 TensorCores)."""
    bytes_per_b = 2 * N * E * 4 + 2 * Sp * (E + N) * 4 + Sp * E * 4
    cap_vmem = max(1, (12 * 1024 * 1024) // max(bytes_per_b, 1))
    cap_rows = max(1, 512 // max(Sp, 1))
    cap = max(1, min(cap_vmem, cap_rows))
    if B >= 2:
        cap = min(cap, max(1, B // 2))
    bt = 1
    for d in range(1, min(B, cap) + 1):
        if B % d == 0:
            bt = d
    return bt


def _vmem_bytes_estimate(Bt, N, E, Sp, H):
    S2 = H * Sp
    x_blk = Bt * N * E * 4                                    # f32 X block
    consts = (S2 * E * 2 + S2 * 4 + Sp * E * 4 + H * E * E * 2
              + E * 4 + E * E * 2 + E * 4)
    outs = Bt * Sp * (E + N) * 4
    scratch = Bt * Sp * E * 4
    live = Bt * S2 * (2 * N + E) * 4                          # s / p / u intermediates
    # inputs/outputs are double-buffered by the BlockSpec pipeline
    return 2 * (x_blk + consts + outs) + scratch + live


def nlp_forward(X, params, num_heads, block_b=None):
    """X: (B, N, E) float32. Returns (ret (B, Sn, E), attn head-averaged, squeezed)."""
    B, N, E = X.shape
    f32, bf16 = jnp.float32, jnp.bfloat16
    S = params["S"].astype(f32)
    Sn = S.shape[0]
    H = num_heads
    assert E % H == 0, "dim must be divisible by num_heads"
    D = E // H
    # Lane-dense output stores (biggest single lever per review); the kernel
    # itself places no constraint on D.
    assert E % 128 == 0, "embedding dim should be a multiple of 128"
    assert N % 128 == 0, "sequence length should be a multiple of 128"

    Sp = max(16, ((Sn + 15) // 16) * 16)      # pad seeds to bf16 sublane tile (16)
    S2 = H * Sp

    Bt = _pick_block_b(B, N, E, Sp) if block_b is None else block_b
    assert B % Bt == 0

    w_in = params["w_in"].astype(f32)
    b_in = params["b_in"].reshape(-1).astype(f32)
    wq, bq = params["wq"].astype(f32), params["bq"].reshape(-1).astype(f32)
    wk, bk = params["wk"].astype(f32), params["bk"].reshape(-1).astype(f32)
    wv, bv = params["wv"].astype(f32), params["bv"].reshape(-1).astype(f32)
    w_out, b_out = params["w_out"].astype(f32), params["b_out"].reshape(-1).astype(f32)
    w_fco, b_fco = params["w_fco"].astype(f32), params["b_fco"].reshape(-1).astype(f32)

    # ---- Batch-invariant Q path + algebraic folds (once, in f32, outside grid)
    S_pad = jnp.zeros((Sp, E), f32).at[:Sn].set(S)
    Qp = S_pad @ wq.T + bq                                    # fc_q(S): (Sp, E)
    qin = (Qp @ w_in[0:E].T + b_in[0:E]) * (1.0 / math.sqrt(D))
    q3 = qin.reshape(Sp, H, D).transpose(1, 0, 2)             # (H, Sp, D)

    Wkin3 = w_in[E:2 * E].reshape(H, D, E)
    bkin3 = b_in[E:2 * E].reshape(H, D)
    Wvin3 = w_in[2 * E:3 * E].reshape(H, D, E)
    bvin3 = b_in[2 * E:3 * E].reshape(H, D)
    WoutT3 = w_out.T.reshape(H, D, E)                         # [h,d,f] = w_out[f, h*D+d]

    # K-path fold: scores_h = (q_h @ Wkin_h @ Wk) @ X^T + qbias_h
    qk = jnp.einsum('hsd,hde->hse', q3, Wkin3)
    qfold = jnp.einsum('hse,ef->hsf', qk, wk).reshape(S2, E)
    qbias = (jnp.einsum('hse,e->hs', qk, bk)
             + jnp.einsum('hsd,hd->hs', q3, bkin3)).reshape(S2, 1)

    # V-path fold: A = sum_h (p_h @ X) @ Weff_h + beff   (uses sum_n p = 1)
    tmp = jnp.einsum('hde,ef->hdf', Wvin3, wv)                # Wvin_h @ Wv
    weff = jnp.einsum('hdx,hdf->hxf', tmp, WoutT3)            # (H, E, E)
    t2 = jnp.einsum('hde,e->hd', Wvin3, bv) + bvin3
    beff = (b_out + jnp.einsum('hd,hdf->f', t2, WoutT3)).reshape(1, E)

    qfold = qfold.astype(bf16)
    weff = weff.astype(bf16)
    wfcoT = w_fco.T.astype(bf16)
    bfco = b_fco.reshape(1, E)

    kernel = functools.partial(_nlp_kernel, num_heads=H, block_b=Bt,
                               seeds_padded=Sp)

    def c2(a):
        return pl.BlockSpec(a.shape, lambda b: (0, 0))

    def c3(a):
        return pl.BlockSpec(a.shape, lambda b: (0, 0, 0))

    in_specs = [
        pl.BlockSpec((Bt, N, E), lambda b: (b, 0, 0)),        # X block (f32)
        c2(qfold), c2(qbias), c2(Qp), c3(weff), c2(beff), c2(wfcoT), c2(bfco),
    ]
    out_specs = [
        pl.BlockSpec((Bt, Sp, E), lambda b: (b, 0, 0)),
        pl.BlockSpec((Bt, Sp, N), lambda b: (b, 0, 0)),
    ]
    out_shape = [
        jax.ShapeDtypeStruct((B, Sp, E), f32),
        jax.ShapeDtypeStruct((B, Sp, N), f32),
    ]

    vmem_need = _vmem_bytes_estimate(Bt, N, E, Sp, H)
    cp_kwargs = dict(dimension_semantics=("parallel",))
    if vmem_need > 32 * 1024 * 1024:
        # Raise the scoped-VMEM limit only when needed; stay below v7x's 64 MiB.
        cp_kwargs["vmem_limit_bytes"] = int(min(vmem_need + (4 << 20),
                                                60 * 1024 * 1024))

    ret_p, attn_p = pl.pallas_call(
        kernel,
        out_shape=out_shape,
        grid_spec=pltpu.PrefetchScalarGridSpec(
            num_scalar_prefetch=0,
            grid=(B // Bt,),
            in_specs=in_specs,
            out_specs=out_specs,
            scratch_shapes=[pltpu.VMEM((Bt * Sp, E), f32)],
        ),
        compiler_params=pltpu.CompilerParams(**cp_kwargs),
    )(X.astype(f32), qfold, qbias, Qp, weff, beff, wfcoT, bfco)

    ret = ret_p[:, :Sn, :]
    attn = attn_p[:, :Sn, :]
    # PyTorch returns attn.squeeze()
    return ret, jnp.squeeze(attn)


def nlp_reference(X, params, num_heads):
    """Pure-JAX f32 reference: same math as the PyTorch module, step by step."""
    B, N, E = X.shape
    S = params["S"].astype(jnp.float32)
    Sn = S.shape[0]
    H = num_heads
    D = E // H

    def lin(x, w, b):
        return jnp.einsum('...i,oi->...o', x, w) + b

    w_in = params["w_in"]
    b_in = params["b_in"][0]

    Qp = lin(S, params["wq"], params["bq"][0])                # (Sn, E)
    Kp = lin(X, params["wk"], params["bk"][0])                # (B, N, E)
    Vp = lin(X, params["wv"], params["bv"][0])

    q = lin(Qp, w_in[0:E], b_in[0:E]) * (1.0 / math.sqrt(D))
    k = lin(Kp, w_in[E:2 * E], b_in[E:2 * E])
    v = lin(Vp, w_in[2 * E:3 * E], b_in[2 * E:3 * E])

    qh = q.reshape(Sn, H, D).transpose(1, 0, 2)               # (H, Sn, D)
    kh = k.reshape(B, N, H, D).transpose(0, 2, 1, 3)          # (B, H, N, D)
    vh = v.reshape(B, N, H, D).transpose(0, 2, 1, 3)

    scores = jnp.einsum('hsd,bhnd->bhsn', qh, kh)
    p = jax.nn.softmax(scores, axis=-1)                       # (B, H, Sn, N)
    ctx = jnp.einsum('bhsn,bhnd->bhsd', p, vh)
    ctx = ctx.transpose(0, 2, 1, 3).reshape(B, Sn, E)
    A = lin(ctx, params["w_out"], params["b_out"][0])

    O = Qp[None] + A                                          # O = Q + A
    O = O + jax.nn.relu(lin(O, params["w_fco"], params["b_fco"][0]))
    attn = jnp.mean(p, axis=1)                                # head-averaged (B, Sn, N)
    return O, jnp.squeeze(attn)


def make_params(key, dim, num_seeds):
    """Deterministic synthetic parameters (shapes match the PyTorch module)."""
    ks = jax.random.split(key, 16)

    def xavier(k, shape):
        fan_in, fan_out = shape[1], shape[0]
        bound = math.sqrt(6.0 / (fan_in + fan_out))
        return jax.random.uniform(k, shape, jnp.float32, -bound, bound)

    E = dim
    return {
        "S": xavier(ks[0], (num_seeds, E)),          # nn.Parameter (1, num_seeds, dim)
        "wq": xavier(ks[1], (E, E)),  "bq": jax.random.normal(ks[2], (1, E)) * 0.02,
        "wk": xavier(ks[3], (E, E)),  "bk": jax.random.normal(ks[4], (1, E)) * 0.02,
        "wv": xavier(ks[5], (E, E)),  "bv": jax.random.normal(ks[6], (1, E)) * 0.02,
        "w_in": xavier(ks[7], (3 * E, E)), "b_in": jax.random.normal(ks[8], (1, 3 * E)) * 0.02,
        "w_out": xavier(ks[9], (E, E)), "b_out": jax.random.normal(ks[10], (1, E)) * 0.02,
        "w_fco": xavier(ks[11], (E, E)), "b_fco": jax.random.normal(ks[12], (1, E)) * 0.02,
    }


if __name__ == "__main__":
    B, N, dim = 4, 128, 128
    num_heads, num_seeds = 4, 4

    key = jax.random.PRNGKey(0)
    k_x, k_p = jax.random.split(key)
    X = jax.random.normal(k_x, (B, N, dim), jnp.float32)
    params = make_params(k_p, dim, num_seeds)

    ret, attn = nlp_forward(X, params, num_heads)
    ret = jax.block_until_ready(ret)
    attn = jax.block_until_ready(attn)

    ret_ref, attn_ref = nlp_reference(X, params, num_heads)
    np.testing.assert_allclose(np.asarray(ret), np.asarray(ret_ref), rtol=5e-3, atol=5e-3)
    np.testing.assert_allclose(np.asarray(attn), np.asarray(attn_ref), rtol=5e-3, atol=5e-3)

    print("KERNEL_OK")
</pallas_src>

<mosaic_0001>
module attributes {stable_mosaic.version = 11 : i64} {
  func.func @_nlp_kernel(%arg0: i32, %arg1: memref<2x128x128xf32, #tpu.memory_space<vmem>>, %arg2: memref<64x128xbf16, #tpu.memory_space<vmem>>, %arg3: memref<64x1xf32, #tpu.memory_space<vmem>>, %arg4: memref<16x128xf32, #tpu.memory_space<vmem>>, %arg5: memref<4x128x128xbf16, #tpu.memory_space<vmem>>, %arg6: memref<1x128xf32, #tpu.memory_space<vmem>>, %arg7: memref<128x128xbf16, #tpu.memory_space<vmem>>, %arg8: memref<1x128xf32, #tpu.memory_space<vmem>>, %arg9: memref<2x16x128xf32, #tpu.memory_space<vmem>>, %arg10: memref<2x16x128xf32, #tpu.memory_space<vmem>>, %arg11: memref<32x128xf32, #tpu.memory_space<vmem>>) attributes {dimension_semantics = [#tpu.dimension_semantics<parallel>], iteration_bounds = array<i64: 2>, scalar_prefetch = 0 : i64, scratch_operands = 1 : i64, tpu.core_type = #tpu.core_type<tc>, window_params = [{transform_indices = @transform_0, window_bounds = array<i64: 2, 128, 128>}, {pipeline_mode = #tpu.pipeline_mode<synchronous>, transform_indices = @transform_1, window_bounds = array<i64: 64, 128>}, {pipeline_mode = #tpu.pipeline_mode<synchronous>, transform_indices = @transform_2, window_bounds = array<i64: 64, 1>}, {pipeline_mode = #tpu.pipeline_mode<synchronous>, transform_indices = @transform_3, window_bounds = array<i64: 16, 128>}, {pipeline_mode = #tpu.pipeline_mode<synchronous>, transform_indices = @transform_4, window_bounds = array<i64: 4, 128, 128>}, {pipeline_mode = #tpu.pipeline_mode<synchronous>, transform_indices = @transform_5, window_bounds = array<i64: 1, 128>}, {pipeline_mode = #tpu.pipeline_mode<synchronous>, transform_indices = @transform_6, window_bounds = array<i64: 128, 128>}, {pipeline_mode = #tpu.pipeline_mode<synchronous>, transform_indices = @transform_7, window_bounds = array<i64: 1, 128>}, {transform_indices = @transform_8, window_bounds = array<i64: 2, 16, 128>}, {transform_indices = @transform_9, window_bounds = array<i64: 2, 16, 128>}]} {
    %c0 = arith.constant 0 : index
    %c0_0 = arith.constant 0 : index
    %c0_1 = arith.constant 0 : index
    %0 = vector.load %arg1[%c0, %c0_0, %c0_1] : memref<2x128x128xf32, #tpu.memory_space<vmem>>, vector<2x128x128xf32>
    %1 = arith.truncf %0 : vector<2x128x128xf32> to vector<2x128x128xbf16>
    %c0_2 = arith.constant 0 : index
    %c0_3 = arith.constant 0 : index
    %2 = vector.load %arg2[%c0_2, %c0_3] : memref<64x128xbf16, #tpu.memory_space<vmem>>, vector<64x128xbf16>
    %3 = vector.shape_cast %2 : vector<64x128xbf16> to vector<1x64x128xbf16>
    %4 = vector.shape_cast %3 : vector<1x64x128xbf16> to vector<1x64x128xbf16>
    %5 = vector.broadcast %4 : vector<1x64x128xbf16> to vector<2x64x128xbf16>
    "tpu.trace_start"() <{level = 10 : i32, message = "bse,bne->bsn"}> : () -> ()
    %cst = arith.constant dense<0.000000e+00> : vector<2x64x128xf32>
    %6 = tpu.matmul %5, %1, %cst {dimension_numbers = #tpu.dot_dimension_numbers<[2], [2], [1], [1], [0, 0, 0, 1, 1, 1], [0], [0]>} : vector<2x64x128xbf16>, vector<2x128x128xbf16>, vector<2x64x128xf32> -> vector<2x64x128xf32>
    "tpu.trace_stop"() : () -> ()
    %c0_4 = arith.constant 0 : index
    %c0_5 = arith.constant 0 : index
    %7 = vector.load %arg3[%c0_4, %c0_5] : memref<64x1xf32, #tpu.memory_space<vmem>>, vector<64x1xf32>
    %8 = vector.shape_cast %7 : vector<64x1xf32> to vector<1x64x1xf32>
    %9 = vector.broadcast %8 : vector<1x64x1xf32> to vector<2x64x128xf32>
    %10 = arith.addf %6, %9 : vector<2x64x128xf32>
    %cst_6 = arith.constant dense<0xFF800000> : vector<2x64xf32>
    %11 = vector.multi_reduction <maximumf>, %10, %cst_6 [2] : vector<2x64x128xf32> to vector<2x64xf32>
    %12 = vector.shape_cast %11 : vector<2x64xf32> to vector<2x64x1xf32>
    %13 = vector.broadcast %12 : vector<2x64x1xf32> to vector<2x64x128xf32>
    %14 = arith.subf %10, %13 : vector<2x64x128xf32>
    %15 = math.exp %14 : vector<2x64x128xf32>
    %cst_7 = arith.constant dense<0.000000e+00> : vector<2x64xf32>
    %16 = vector.multi_reduction <add>, %15, %cst_7 [2] : vector<2x64x128xf32> to vector<2x64xf32>
    %17 = vector.shape_cast %16 : vector<2x64xf32> to vector<2x64x1xf32>
    %18 = tpu.reciprocal %17 {approx = true} : vector<2x64x1xf32> -> vector<2x64x1xf32>
    %19 = vector.broadcast %18 : vector<2x64x1xf32> to vector<2x64x128xf32>
    %20 = arith.mulf %15, %19 : vector<2x64x128xf32>
    %21 = vector.shape_cast %20 : vector<2x64x128xf32> to vector<2x4x16x128xf32>
    %cst_8 = arith.constant dense<0.000000e+00> : vector<2x16x128xf32>
    %22 = vector.multi_reduction <add>, %21, %cst_8 [1] : vector<2x4x16x128xf32> to vector<2x16x128xf32>
    %cst_9 = arith.constant 2.500000e-01 : f32
    %23 = vector.broadcast %cst_9 : f32 to vector<2x16x128xf32>
    %24 = arith.mulf %22, %23 : vector<2x16x128xf32>
    %c0_10 = arith.constant 0 : index
    %c0_11 = arith.constant 0 : index
    %c0_12 = arith.constant 0 : index
    %25 = vector.load %arg10[%c0_10, %c0_11, %c0_12] : memref<2x16x128xf32, #tpu.memory_space<vmem>>, vector<2x16x128xf32>
    tpu.vector_store %arg10[%c0_10, %c0_11, %c0_12], %24 {strides = array<i32>} : memref<2x16x128xf32, #tpu.memory_space<vmem>>, vector<2x16x128xf32>,
    %26 = arith.truncf %20 : vector<2x64x128xf32> to vector<2x64x128xbf16>
    "tpu.trace_start"() <{level = 10 : i32, message = "bsn,bne->bse"}> : () -> ()
    %cst_13 = arith.constant dense<0.000000e+00> : vector<2x64x128xf32>
    %27 = tpu.matmul %26, %1, %cst_13 {dimension_numbers = #tpu.dot_dimension_numbers<[2], [1], [1], [2], [0, 0, 0, 1, 1, 2], [0], [0]>} : vector<2x64x128xbf16>, vector<2x128x128xbf16>, vector<2x64x128xf32> -> vector<2x64x128xf32>
    "tpu.trace_stop"() : () -> ()
    %28 = arith.truncf %27 : vector<2x64x128xf32> to vector<2x64x128xbf16>
    %29 = vector.extract_strided_slice %28 {offsets = [0, 0, 0], sizes = [2, 16, 128], strides = [1, 1, 1]} : vector<2x64x128xbf16> to vector<2x16x128xbf16>
    %30 = vector.shape_cast %29 : vector<2x16x128xbf16> to vector<32x128xbf16>
    %c0_14 = arith.constant 0 : index
    %c0_15 = arith.constant 0 : index
    %c0_16 = arith.constant 0 : index
    %31 = vector.load %arg5[%c0_14, %c0_15, %c0_16] : memref<4x128x128xbf16, #tpu.memory_space<vmem>>, vector<1x128x128xbf16>
    %32 = vector.shape_cast %31 : vector<1x128x128xbf16> to vector<128x128xbf16>
    %cst_17 = arith.constant dense<0.000000e+00> : vector<32x128xf32>
    %33 = tpu.matmul %30, %32, %cst_17 {dimension_numbers = #tpu.dot_dimension_numbers<[1], [0], [0], [1], [0, 0, 1, 1], [], []>} : vector<32x128xbf16>, vector<128x128xbf16>, vector<32x128xf32> -> vector<32x128xf32>
    %c0_18 = arith.constant 0 : index
    %c0_19 = arith.constant 0 : index
    %34 = vector.load %arg11[%c0_18, %c0_19] : memref<32x128xf32, #tpu.memory_space<vmem>>, vector<32x128xf32>
    tpu.vector_store %arg11[%c0_18, %c0_19], %33 {strides = array<i32>} : memref<32x128xf32, #tpu.memory_space<vmem>>, vector<32x128xf32>,
    %c0_20 = arith.constant 0 : index
    %c0_21 = arith.constant 0 : index
    %35 = vector.load %arg11[%c0_20, %c0_21] : memref<32x128xf32, #tpu.memory_space<vmem>>, vector<32x128xf32>
    %36 = vector.extract_strided_slice %28 {offsets = [0, 16, 0], sizes = [2, 16, 128], strides = [1, 1, 1]} : vector<2x64x128xbf16> to vector<2x16x128xbf16>
    %37 = vector.shape_cast %36 : vector<2x16x128xbf16> to vector<32x128xbf16>
    %c1 = arith.constant 1 : index
    %c0_22 = arith.constant 0 : index
    %c0_23 = arith.constant 0 : index
    %38 = vector.load %arg5[%c1, %c0_22, %c0_23] : memref<4x128x128xbf16, #tpu.memory_space<vmem>>, vector<1x128x128xbf16>
    %39 = vector.shape_cast %38 : vector<1x128x128xbf16> to vector<128x128xbf16>
    %cst_24 = arith.constant dense<0.000000e+00> : vector<32x128xf32>
    %40 = tpu.matmul %37, %39, %cst_24 {dimension_numbers = #tpu.dot_dimension_numbers<[1], [0], [0], [1], [0, 0, 1, 1], [], []>} : vector<32x128xbf16>, vector<128x128xbf16>, vector<32x128xf32> -> vector<32x128xf32>
    %41 = arith.addf %35, %40 : vector<32x128xf32>
    %c0_25 = arith.constant 0 : index
    %c0_26 = arith.constant 0 : index
    %42 = vector.load %arg11[%c0_25, %c0_26] : memref<32x128xf32, #tpu.memory_space<vmem>>, vector<32x128xf32>
    tpu.vector_store %arg11[%c0_25, %c0_26], %41 {strides = array<i32>} : memref<32x128xf32, #tpu.memory_space<vmem>>, vector<32x128xf32>,
    %c0_27 = arith.constant 0 : index
    %c0_28 = arith.constant 0 : index
    %43 = vector.load %arg11[%c0_27, %c0_28] : memref<32x128xf32, #tpu.memory_space<vmem>>, vector<32x128xf32>
    %44 = vector.extract_strided_slice %28 {offsets = [0, 32, 0], sizes = [2, 16, 128], strides = [1, 1, 1]} : vector<2x64x128xbf16> to vector<2x16x128xbf16>
    %45 = vector.shape_cast %44 : vector<2x16x128xbf16> to vector<32x128xbf16>
    %c2 = arith.constant 2 : index
    %c0_29 = arith.constant 0 : index
    %c0_30 = arith.constant 0 : index
    %46 = vector.load %arg5[%c2, %c0_29, %c0_30] : memref<4x128x128xbf16, #tpu.memory_space<vmem>>, vector<1x128x128xbf16>
    %47 = vector.shape_cast %46 : vector<1x128x128xbf16> to vector<128x128xbf16>
    %cst_31 = arith.constant dense<0.000000e+00> : vector<32x128xf32>
    %48 = tpu.matmul %45, %47, %cst_31 {dimension_numbers = #tpu.dot_dimension_numbers<[1], [0], [0], [1], [0, 0, 1, 1], [], []>} : vector<32x128xbf16>, vector<128x128xbf16>, vector<32x128xf32> -> vector<32x128xf32>
    %49 = arith.addf %43, %48 : vector<32x128xf32>
    %c0_32 = arith.constant 0 : index
    %c0_33 = arith.constant 0 : index
    %50 = vector.load %arg11[%c0_32, %c0_33] : memref<32x128xf32, #tpu.memory_space<vmem>>, vector<32x128xf32>
    tpu.vector_store %arg11[%c0_32, %c0_33], %49 {strides = array<i32>} : memref<32x128xf32, #tpu.memory_space<vmem>>, vector<32x128xf32>,
    %c0_34 = arith.constant 0 : index
    %c0_35 = arith.constant 0 : index
    %51 = vector.load %arg11[%c0_34, %c0_35] : memref<32x128xf32, #tpu.memory_space<vmem>>, vector<32x128xf32>
    %52 = vector.extract_strided_slice %28 {offsets = [0, 48, 0], sizes = [2, 16, 128], strides = [1, 1, 1]} : vector<2x64x128xbf16> to vector<2x16x128xbf16>
    %53 = vector.shape_cast %52 : vector<2x16x128xbf16> to vector<32x128xbf16>
    %c3 = arith.constant 3 : index
    %c0_36 = arith.constant 0 : index
    %c0_37 = arith.constant 0 : index
    %54 = vector.load %arg5[%c3, %c0_36, %c0_37] : memref<4x128x128xbf16, #tpu.memory_space<vmem>>, vector<1x128x128xbf16>
    %55 = vector.shape_cast %54 : vector<1x128x128xbf16> to vector<128x128xbf16>
    %cst_38 = arith.constant dense<0.000000e+00> : vector<32x128xf32>
    %56 = tpu.matmul %53, %55, %cst_38 {dimension_numbers = #tpu.dot_dimension_numbers<[1], [0], [0], [1], [0, 0, 1, 1], [], []>} : vector<32x128xbf16>, vector<128x128xbf16>, vector<32x128xf32> -> vector<32x128xf32>
    %57 = arith.addf %51, %56 : vector<32x128xf32>
    %c0_39 = arith.constant 0 : index
    %c0_40 = arith.constant 0 : index
    %58 = vector.load %arg11[%c0_39, %c0_40] : memref<32x128xf32, #tpu.memory_space<vmem>>, vector<32x128xf32>
    tpu.vector_store %arg11[%c0_39, %c0_40], %57 {strides = array<i32>} : memref<32x128xf32, #tpu.memory_space<vmem>>, vector<32x128xf32>,
    %c0_41 = arith.constant 0 : index
    %c0_42 = arith.constant 0 : index
    %59 = vector.load %arg11[%c0_41, %c0_42] : memref<32x128xf32, #tpu.memory_space<vmem>>, vector<32x128xf32>
    %c0_43 = arith.constant 0 : index
    %c0_44 = arith.constant 0 : index
    %60 = vector.load %arg6[%c0_43, %c0_44] : memref<1x128xf32, #tpu.memory_space<vmem>>, vector<1x128xf32>
    %61 = vector.broadcast %60 : vector<1x128xf32> to vector<32x128xf32>
    %62 = arith.addf %59, %61 : vector<32x128xf32>
    %63 = vector.shape_cast %62 : vector<32x128xf32> to vector<2x16x128xf32>
    %c0_45 = arith.constant 0 : index
    %c0_46 = arith.constant 0 : index
    %64 = vector.load %arg4[%c0_45, %c0_46] : memref<16x128xf32, #tpu.memory_space<vmem>>, vector<16x128xf32>
    %65 = vector.shape_cast %64 : vector<16x128xf32> to vector<1x16x128xf32>
    %66 = vector.broadcast %65 : vector<1x16x128xf32> to vector<2x16x128xf32>
    %67 = arith.addf %63, %66 : vector<2x16x128xf32>
    %68 = vector.shape_cast %67 : vector<2x16x128xf32> to vector<32x128xf32>
    %69 = arith.truncf %68 : vector<32x128xf32> to vector<32x128xbf16>
    %c0_47 = arith.constant 0 : index
    %c0_48 = arith.constant 0 : index
    %70 = vector.load %arg7[%c0_47, %c0_48] : memref<128x128xbf16, #tpu.memory_space<vmem>>, vector<128x128xbf16>
    %cst_49 = arith.constant dense<0.000000e+00> : vector<32x128xf32>
    %71 = tpu.matmul %69, %70, %cst_49 {dimension_numbers = #tpu.dot_dimension_numbers<[1], [0], [0], [1], [0, 0, 1, 1], [], []>} : vector<32x128xbf16>, vector<128x128xbf16>, vector<32x128xf32> -> vector<32x128xf32>
    %c0_50 = arith.constant 0 : index
    %c0_51 = arith.constant 0 : index
    %72 = vector.load %arg8[%c0_50, %c0_51] : memref<1x128xf32, #tpu.memory_space<vmem>>, vector<1x128xf32>
    %73 = vector.broadcast %72 : vector<1x128xf32> to vector<32x128xf32>
    %74 = arith.addf %71, %73 : vector<32x128xf32>
    %cst_52 = arith.constant 0.000000e+00 : f32
    %75 = vector.broadcast %cst_52 : f32 to vector<32x128xf32>
    %76 = arith.maximumf %74, %75 : vector<32x128xf32>
    %77 = vector.shape_cast %76 : vector<32x128xf32> to vector<2x16x128xf32>
    %78 = arith.addf %67, %77 : vector<2x16x128xf32>
    %c0_53 = arith.constant 0 : index
    %c0_54 = arith.constant 0 : index
    %c0_55 = arith.constant 0 : index
    %79 = vector.load %arg9[%c0_53, %c0_54, %c0_55] : memref<2x16x128xf32, #tpu.memory_space<vmem>>, vector<2x16x128xf32>
    tpu.vector_store %arg9[%c0_53, %c0_54, %c0_55], %78 {strides = array<i32>} : memref<2x16x128xf32, #tpu.memory_space<vmem>>, vector<2x16x128xf32>,
    return
  }
  func.func @transform_0(%arg0: i32) -> (i32, i32, i32) {
    %c0_i32 = arith.constant 0 : i32
    %c0_i32_0 = arith.constant 0 : i32
    %c0_i32_1 = arith.constant 0 : i32
    return %arg0, %c0_i32, %c0_i32_0 : i32, i32, i32
  }
  func.func @transform_1(%arg0: i32) -> (i32, i32) {
    %c0_i32 = arith.constant 0 : i32
    %c0_i32_0 = arith.constant 0 : i32
    %c0_i32_1 = arith.constant 0 : i32
    return %c0_i32, %c0_i32_0 : i32, i32
  }
  func.func @transform_2(%arg0: i32) -> (i32, i32) {
    %c0_i32 = arith.constant 0 : i32
    %c0_i32_0 = arith.constant 0 : i32
    %c0_i32_1 = arith.constant 0 : i32
    return %c0_i32, %c0_i32_0 : i32, i32
  }
  func.func @transform_3(%arg0: i32) -> (i32, i32) {
    %c0_i32 = arith.constant 0 : i32
    %c0_i32_0 = arith.constant 0 : i32
    %c0_i32_1 = arith.constant 0 : i32
    return %c0_i32, %c0_i32_0 : i32, i32
  }
  func.func @transform_4(%arg0: i32) -> (i32, i32, i32) {
    %c0_i32 = arith.constant 0 : i32
    %c0_i32_0 = arith.constant 0 : i32
    %c0_i32_1 = arith.constant 0 : i32
    %c0_i32_2 = arith.constant 0 : i32
    return %c0_i32, %c0_i32_0, %c0_i32_1 : i32, i32, i32
  }
  func.func @transform_5(%arg0: i32) -> (i32, i32) {
    %c0_i32 = arith.constant 0 : i32
    %c0_i32_0 = arith.constant 0 : i32
    %c0_i32_1 = arith.constant 0 : i32
    return %c0_i32, %c0_i32_0 : i32, i32
  }
  func.func @transform_6(%arg0: i32) -> (i32, i32) {
    %c0_i32 = arith.constant 0 : i32
    %c0_i32_0 = arith.constant 0 : i32
    %c0_i32_1 = arith.constant 0 : i32
    return %c0_i32, %c0_i32_0 : i32, i32
  }
  func.func @transform_7(%arg0: i32) -> (i32, i32) {
    %c0_i32 = arith.constant 0 : i32
    %c0_i32_0 = arith.constant 0 : i32
    %c0_i32_1 = arith.constant 0 : i32
    return %c0_i32, %c0_i32_0 : i32, i32
  }
  func.func @transform_8(%arg0: i32) -> (i32, i32, i32) {
    %c0_i32 = arith.constant 0 : i32
    %c0_i32_0 = arith.constant 0 : i32
    %c0_i32_1 = arith.constant 0 : i32
    return %arg0, %c0_i32, %c0_i32_0 : i32, i32, i32
  }
  func.func @transform_9(%arg0: i32) -> (i32, i32, i32) {
    %c0_i32 = arith.constant 0 : i32
    %c0_i32_0 = arith.constant 0 : i32
    %c0_i32_1 = arith.constant 0 : i32
    return %arg0, %c0_i32, %c0_i32_0 : i32, i32, i32
  }
}

</mosaic_0001>

<bundles_post_ra>
// kernel: tpu_custom_call.1
= control target key start
LH: loop header
LB: loop body
LE: loop exit
PB: predicated region body
PF: predicated region fallthrough
CT: control target
= control target key end

     0   :  { %s3143_s0 = inlined_call_operand.hbm [shape: f32[4,128,128], index: 0, kind: input, shape index: {}]   ;;  %s3144_s1 = inlined_call_operand.hbm [shape: bf16[64,128], index: 1, kind: input, shape index: {}]   ;;  %s3145_s2 = inlined_call_operand.vmem [shape: f32[64,1], index: 2, kind: input, shape index: {}]   ;;  %s3146_s3 = inlined_call_operand.hbm [shape: f32[16,128], index: 3, kind: input, shape index: {}]   ;;  %s3147_s4 = inlined_call_operand.hbm [shape: bf16[4,128,128], index: 4, kind: input, shape index: {}]   ;;  %s3148_s5 = inlined_call_operand.vmem [shape: f32[1,128], index: 5, kind: input, shape index: {}]   ;;  %s3149_s6 = inlined_call_operand.vmem [shape: bf16[128,128], index: 6, kind: input, shape index: {}]   ;;  %s3150_s7 = inlined_call_operand.vmem [shape: f32[1,128], index: 7, kind: input, shape index: {}]   ;;  %s3151_s8 = inlined_call_operand.hbm [shape: f32[4,16,128], index: 8, kind: output, shape index: {0}]   ;;  %s3152_s9 = inlined_call_operand.hbm [shape: f32[4,16,128], index: 9, kind: output, shape index: {1}]  }
   0x1   :  { %3159 = sst [smem:[#allocation19_spill]] %s3144_s1 }
   0x2   :  { %3160 = sst [smem:[#allocation20_spill]] %s3146_s3 }
   0x3   :  { %3161 = sst [smem:[#allocation21_spill]] %s3147_s4 }
   0x4   :  { %15 = vsyncpa [#allocation4], 0 }
   0x5   :  { %17 = vsyncpa [#allocation4 + $0x1], 0 }
   0x6   :  { %18 = vsyncpa [#allocation7], 0 }
   0x7   :  { %19 = vsyncpa [#allocation10], 0 }
   0x8   :  { %20 = vsyncpa [#allocation5], 0 }
   0x9   :  { %22 = vsyncpa [#allocation5 + $0x1], 0 }
   0xa   :  { %23 = vsyncpa [#allocation13], 0 }
   0xb   :  { %25 = vsyncpa [#allocation13 + $0x1], 0  ;;  %s2645_s30 = smov 0   ;;  %s2647_s10 = smov 0  }
   0xc   :  { %s2649_s11 = smov 0   ;;  %s2651_s12 = smov 0  }
   0xd LB: > { %s2666_s13 = sadd.s32 4294967295, %s2580_s12   ;;  %s1800_s14 = sadd.s32 4294967294, %s2580_s12   ;;  %s2580_s12 = sphi %s2651_s12, %s3185_s12   ;;  %s2576_s11 = sphi %s2649_s11, %s3184_s11   ;;  %s2572_s10 = sphi %s2647_s10, %s3183_s10   ;;  %s2568_s30 = sphi %s2645_s30, %s3182_s30  }
   0xe   : > { %p51_p0 = scmp.ne.s32.totalorder %s2572_s10, %s2568_s30  ;;  %p3155_p1 = scmp.eq.s32.totalorder %s2666_s13, 0 }
   0xf   : > { %p222_p2 = scmp.eq.s32.totalorder %s2666_s13, 1  ;;  %p228_p3 = scmp.eq.s32.totalorder %s1800_s14, 1 }
  0x10   : > { %p2675_p4 = por %p3155_p1, %p51_p0  ;;  %p1801_p5 = scmp.ge.s32.totalorder %s2580_s12, 1 }
  0x11   : > { %p2680_p6 = por %p228_p3, %p51_p0  ;;  %p261_p7 = scmp.lt.s32.totalorder %s2580_s12, 3 }
  0x12   : > { %s3162_s15 = scalar_select %p2675_p4, 1, 0 }
  0x13   : > { %s3163_s16 = scalar_select %p2680_p6, 1, 0 }
  0x14   : > { %p2685_p8 = pnand %p1801_p5, %p261_p7  ;;  %s2582_s18 = smov [#allocation6]  }
  0x15   : > { %s273_s19 = sshll.u32 %s2582_s18, 4  ;;  %s2583_s21 = smov [#allocation8]   ;;  %s274_s19 = int_to_ptr.vmem [resolvable:$true] %s273_s19 }
  0x16   : > { %s3164_s17 = scalar_select %p2685_p8, 1, 0 }
  0x17   : > { %p2191_p9 = pneg %p2685_p8  ;;  %s289_s22 = sshll.u32 %s2583_s21, 4  ;;  %s290_s22 = int_to_ptr.vmem [resolvable:$true] %s289_s22 }
  0x18   : > { %s2383_s23 = scalar_lea.vmem %s274_s19, 512  ;;  %p2391_p5 = scmp.lt.s32.totalorder %s274_s19, %s274_s19 }
  0x19   : > { %p2694_p11 = pnand %p2191_p9, %p3155_p1  ;;  %p2384_p13 = scmp.ne.s32.totalorder %s274_s19, %s2383_s23 }
  0x1a   : > { %p2392_p7 = scmp.lt.s32.totalorder %s2383_s23, %s2383_s23 }
  0x1b   : > { %p2374_p12 = pneg %p2694_p11 }
  0x1c   : > { %p2393_p10 = por %p2392_p7, %p2391_p5 }
  0x1d   : > { %p2386_p0 = pnand %p2384_p13, %p2374_p12 }
  0x1f   : > { %p2387_p3 = pneg %p2386_p0 }
  0x21   : > { %p2394_p9 = pnand %p2393_p10, %p2387_p3 }
  0x23   : > { %2397 = shalt.err (!%p2394_p9)
}
  0x24   : > { %s2584_s24 = smov 64   ;;  %s2585_s25 = smov 4  }
  0x25   : > { %s3166_s1 = sld [smem:[#allocation19_spill]]  ;;  %s2409_s28 = scalar_lea.vmem %s290_s22, 256 }
  0x26   : > { %p2410_p13 = scmp.ne.s32.totalorder %s290_s22, %s2409_s28  ;;  %p2417_p10 = scmp.lt.s32.totalorder %s290_s22, %s290_s22 }
  0x27   : > { %p2418_p3 = scmp.lt.s32.totalorder %s2409_s28, %s2409_s28 }
  0x28   : > { %p2412_p0 = pnand %p2410_p13, %p2374_p12 }
  0x29   : > { %p2419_p7 = por %p2418_p3, %p2417_p10 }
  0x2a   : > { %p2413_p5 = pneg %p2412_p0 }
  0x2b   : > { %2194 = dma.hbm_to_vmem [thread:$0]  (!%p2694_p11), %s3166_s1, 512, %s274_s19, [#allocation7], %s2584_s24, %s2584_s24, %s2585_s25  }
  0x2c   : > { %p2420_p9 = pnand %p2419_p7, %p2413_p5 }
  0x2e   : > { %2423 = shalt.err (!%p2420_p9)
}
  0x2f   : > { %s3153_s29 = smov 128   ;;  %s3154_s14 = smov 8  }
  0x30   : > { %s3167_s3 = sld [smem:[#allocation20_spill]]  ;;  %s2588_s21 = smov [#allocation9]  }
  0x31   : > { %s302_s23 = sshll.u32 %s2588_s21, 4  ;;  %s2723_s26 = sadd.s32 1, %s2580_s12   ;;  %s303_s23 = int_to_ptr.vmem [resolvable:$true] %s302_s23 }
  0x32   : > { %s2435_s27 = scalar_lea.vmem %s303_s23, 4096  ;;  %p2443_p10 = scmp.lt.s32.totalorder %s303_s23, %s303_s23 }
  0x33   : > { %p2436_p13 = scmp.ne.s32.totalorder %s303_s23, %s2435_s27  ;;  %p2444_p3 = scmp.lt.s32.totalorder %s2435_s27, %s2435_s27 }
  0x35   : > { %p2438_p0 = pnand %p2436_p13, %p2374_p12  ;;  %p2445_p7 = por %p2444_p3, %p2443_p10 }
  0x36   : > { %2197 = dma.hbm_to_vmem [thread:$0]  (!%p2694_p11), %s3167_s3, 256, %s290_s22, [#allocation7], %s3153_s29, %s3153_s29, %s3154_s14  }
  0x37   : > { %p2439_p5 = pneg %p2438_p0 }
  0x39   : > { %p2446_p9 = pnand %p2445_p7, %p2439_p5 }
  0x3b   : > { %2449 = shalt.err (!%p2446_p9)
}
  0x3c   : > { %s3168_s4 = sld [smem:[#allocation21_spill]]  ;;  %s35_s18 = ssub.s32 %s2580_s12, %s2723_s26 }
  0x3d   : > { %s38_s20 = sadd.s32 1, %s2576_s11  ;;  %p36_p12 = scmp.eq.s32.totalorder %s35_s18, 0 }
  0x3e   : > { %p45_p13 = scmp.ne.s32.totalorder %s2576_s11, %s2572_s10  ;;  %p46_p0 = scmp.eq.s32.totalorder %s2580_s12, 0 }
  0x3f   : > { %p2215_p5 = scmp.lt.s32.totalorder %s2580_s12, 2  ;;  %s325_s27 = sand.u32 1, %s2576_s11  }
  0x40   : > { %s2744_s19 = scalar_select %p36_p12, %s2576_s11, %s38_s20  }
  0x41   : > { %p47_p10 = por %p46_p0, %p45_p13  ;;  %p2748_p3 = por %p222_p2, %p45_p13 }
  0x42   : > { %2200 = dma.hbm_to_vmem [thread:$0]  (!%p2694_p11), %s3168_s4, 4096, %s303_s23, [#allocation10], %s2584_s24, %s2584_s24, %s2585_s25  }
  0x43   : > { %s3169_s21 = scalar_select %p2748_p3, 1, 0 }
  0x44   : > { %s1874_s22 = sshll.u32 %s2580_s12, 12  ;;  %s1806_s28 = sshll.u32 %s325_s27, 8 }
  0x45   : > { %s2757_s24 = scalar_lea.hbm %s3143_s0, %s1874_s22  ;;  %s329_s25 = scalar_lea.vmem [#allocation3], %s1806_s28 }
  0x46   : > { %s337_s23 = sshll.u32 %s329_s25, 4  ;;  %p2759_p11 = pnand %p2215_p5, %p47_p10  ;;  %s2763_s23 = int_to_ptr.vmem [resolvable:$true] %s337_s23 }
  0x47   : > { %s2765_s20 = scalar_lea.sflag [#allocation4], %s325_s27  ;;  %s2450_s1 = scalar_lea.hbm %s2757_s24, 4096 }
  0x48   : > { %p2451_p2 = scmp.ne.s32.totalorder %s2757_s24, %s2450_s1  ;;  %p2452_p7 = pneg %p2759_p11 }
  0x49   : > { %s2455_s22 = scalar_lea.hbm %s3143_s0, 8192  ;;  %p2456_p13 = scmp.lt.s32.totalorder %s2757_s24, %s3143_s0 }
  0x4a   : > { %p2453_p9 = pnand %p2452_p7, %p2451_p2  ;;  %p2457_p0 = scmp.lt.s32.totalorder %s2455_s22, %s2450_s1 }
  0x4c   : > { %p2454_p12 = pneg %p2453_p9  ;;  %p2458_p5 = por %p2457_p0, %p2456_p13 }
  0x4e   : > { %p2459_p10 = pnand %p2458_p5, %p2454_p12 }
  0x50   : > { %2462 = shalt.err (!%p2459_p10)
}
  0x51   : > { %s2463_s27 = scalar_lea.vmem %s2763_s23, 4096  ;;  %s2589_s3 = smov [#allocation3]  }
  0x52   : > { %p2464_p1 = scmp.ne.s32.totalorder %s2763_s23, %s2463_s27  ;;  %s2468_s4 = sshll.u32 %s2589_s3, 4  ;;  %s2469_s4 = int_to_ptr.vmem [resolvable:$false] %s2468_s4 }
  0x53   : > { %s2470_s29 = scalar_lea.vmem %s2469_s4, 8192  ;;  %p2471_p9 = scmp.lt.s32.totalorder %s2763_s23, %s2469_s4 }
  0x54   : > { %p2466_p6 = pnand %p2464_p1, %p2452_p7  ;;  %p2472_p3 = scmp.lt.s32.totalorder %s2470_s29, %s2463_s27 }
  0x56   : > { %p2467_p2 = pneg %p2466_p6  ;;  %p2473_p4 = por %p2472_p3, %p2471_p9 }
  0x58   : > { %p2474_p8 = pnand %p2473_p4, %p2467_p2 }
  0x5a   : > { %2477 = shalt.err (!%p2474_p8)
}
  0x5b   : > { %s3171_s1 = smov 8   ;;  %s3172_s14 = smov 128  }
  0x5c   : > { %2204 = dma.hbm_to_vmem [thread:$0]  (!%p2759_p11), %s2757_s24, 4096, %s2763_s23, %s2765_s20, %s3172_s14, %s3172_s14, %s3171_s1  }
  0x5d   : > { %p3173_p1 = scmp.ne.s32.totalorder %s3164_s17, 0 }
  0x5e   : > { %s2792_s3 = sand.u32 (!%p3173_p1), 1, %s2572_s10   ;;  %p3174_p4 = scmp.ne.s32.totalorder (!%p3173_p1), %s3162_s15, 0 }
  0x5f   : > { %349 = sbr.rel (%p3173_p1) target bundleno = 1363 (0x553), region = 52  ;;  %s1811_s4 = sshll.u32 (!%p3173_p1), %s2792_s3, 8 }
  0x60   : > { %s352_s22 = scalar_lea.sflag (!%p3173_p1), [#allocation4], %s2792_s3  ;;  %s2796_s28 = scalar_lea.vmem (!%p3173_p1), [#allocation3], %s1811_s4 }
  0x64   : > { %2547 = dma.done.wait (%p3174_p4), %s352_s22, 4096  }
  0x65   : > { %2549 = vsyncadd (%p3174_p4), %s352_s22, 4294963200  ;;  %p3175_p6 = scmp.eq.s32.totalorder %s2666_s13, 0 }
  0x67   : > { %2551 = dma.done.wait (%p3175_p6), [#allocation7], 768   ;;  %p3176_p8 = pmov %p3175_p6 }
  0x68   : > { %p3177_p3 = pmov %p3175_p6 }
  0x69   : > { %2553 = vsyncadd (%p3176_p8), [#allocation7], 4294966528 }
  0x6a   : > { %2555 = dma.done.wait (%p3177_p3), [#allocation10], 4096   ;;  %p3178_p11 = pmov %p3177_p3 }
  0x6b   : > { %v2590_v0 = vmov 0   ;;  %v425_v1 = vld [vmem:[%s2796_s28 + $0x70] sm:$0xff]  ;;  %v426_v2 = vld [vmem:[%s2796_s28 + $0x78] sm:$0xff]  ;;  %v423_v6 = vld [vmem:[%s2796_s28 + $0x60] sm:$0xff]  ;;  %s1876_s14 = sshll.u32 %s2666_s13, 9  ;;  %s1635_s24 = scalar_lea.sflag [#allocation13], %s2792_s3 }
  0x6c   : > { %2557 = vsyncadd (%p3178_p11), [#allocation10], 4294963200  ;;  %2263 = vset.pattern.permute.xlu1 %v2590_v0  ;;  %2262 = vset.pattern.permute.xlu0 %v2590_v0  ;;  %v441_v3 = vld [vmem:[%s2796_s28 + $0xf0] sm:$0xff]  ;;  %v2813_v4 = vpack.c.bf16 %v426_v2, %v425_v1  ;;  %v442_v5 = vld [vmem:[%s2796_s28 + $0xf8] sm:$0xff]  ;;  %s3057_s17 = scalar_lea.hbm %s3152_s9, %s1876_s14  ;;  %p3179_p12 = scmp.ne.s32.totalorder %s3169_s21, 0 }
  0x6d   : > { %v424_v7 = vld [vmem:[%s2796_s28 + $0x68] sm:$0xff]  ;;  %v2818_v8 = vpack.c.bf16 %v442_v5, %v441_v3  ;;  %v439_v10 = vld [vmem:[%s2796_s28 + $0xe0] sm:$0xff]  ;;  %v421_v13 = vld [vmem:[%s2796_s28 + $0x50] sm:$0xff]  ;;  %s2591_s20 = smov [#allocation12]  }
  0x6e   : > { %v2820_v9 = vpack.c.bf16 %v424_v7, %v423_v6  ;;  %v440_v11 = vld [vmem:[%s2796_s28 + $0xe8] sm:$0xff]  ;;  %1977 = vmatprep.subr.bf16.mxu0 %v2813_v4  ;;  %v422_v14 = vld [vmem:[%s2796_s28 + $0x58] sm:$0xff]  ;;  %v437_v15 = vld [vmem:[%s2796_s28 + $0xd0] sm:$0xff]  ;;  %s2482_s25 = sshll.u32 %s2591_s20, 4  ;;  %s2483_s25 = int_to_ptr.vmem [resolvable:$false] %s2482_s25 }
  0x6f   : > { %v2825_v12 = vpack.c.bf16 %v440_v11, %v439_v10  ;;  %2001 = vmatprep.subr.bf16.mxu1 %v2818_v8  ;;  %1978 = vmatpush3.bf16.xpose.msra.mxu0 %v2813_v4  ;;  %v438_v16 = vld [vmem:[%s2796_s28 + $0xd8] sm:$0xff]  ;;  %v2836_v17 = vpack.c.bf16 %v422_v14, %v421_v13  ;;  %v2264_v19 = vld [vmem:[#allocation6] sm:$0xff]   ;;  %v420_v21 = vld [vmem:[%s2796_s28 + $0x48] sm:$0xff] }
  0x70   : > { %2002 = vmatpush3.bf16.xpose.msra.mxu1 %v2818_v8  ;;  %1979 = vmatprep.subr.bf16.mxu0 %v2820_v9  ;;  %v2838_v18 = vpack.c.bf16 %v438_v16, %v437_v15  ;;  %v419_v20 = vld [vmem:[%s2796_s28 + $0x40] sm:$0xff]  ;;  %v469_v22 = vld [vmem:[%s3145_s2 + $0x10] sm:$0xff]  ;;  %v436_v24 = vld [vmem:[%s2796_s28 + $0xc8] sm:$0xff] }
  0x71   : > { %2003 = vmatprep.subr.bf16.mxu1 %v2825_v12  ;;  %1993 = vmatprep.mubr.bf16.mxu0 %v2264_v19  ;;  %v435_v23 = vld [vmem:[%s2796_s28 + $0xc0] sm:$0xff]  ;;  %v470_v26 = vld [vmem:[%s3145_s2 + $0x18] sm:$0xff]  ;;  %v2857_v27 = vpack.c.bf16 %v420_v21, %v419_v20  ;;  %v468_v28 = vld [vmem:[%s3145_s2 + $0x8] sm:$0xff] }
  0x72   : > { %2017 = vmatprep.mubr.bf16.mxu1 %v2264_v19  ;;  %487 = vperm.xlu1 %2263, %v469_v22   ;;  %v467_v25 = vld [vmem:[%s3145_s2] sm:$0xff]  ;;  %v2862_v29 = vpack.c.bf16 %v436_v24, %v435_v23  ;;  %v472_v30 = vld [vmem:[%s3145_s2 + $0x28] sm:$0xff]  ;;  %v417_v32 = vld [vmem:[%s2796_s28 + $0x30] sm:$0xff] }
  0x73   : > { %477 = vperm.xlu0 %2262, %v467_v25   ;;  %v471_v31 = vld [vmem:[%s3145_s2 + $0x20] sm:$0xff]  ;;  %v418_v33 = vld [vmem:[%s2796_s28 + $0x38] sm:$0xff]  ;;  %v433_v34 = vld [vmem:[%s2796_s28 + $0xb0] sm:$0xff] }
  0x74   : > { %v434_v35 = vld [vmem:[%s2796_s28 + $0xb8] sm:$0xff]  ;;  %v473_v37 = vld [vmem:[%s3145_s2 + $0x30] sm:$0xff]  ;;  %v2884_v38 = vpack.c.bf16 %v418_v33, %v417_v32  ;;  %v415_v40 = vld [vmem:[%s2796_s28 + $0x20] sm:$0xff] }
  0x75   : > { %v474_v36 = vld [vmem:[%s3145_s2 + $0x38] sm:$0xff]  ;;  %v2886_v39 = vpack.c.bf16 %v434_v35, %v433_v34  ;;  %v416_v41 = vld [vmem:[%s2796_s28 + $0x28] sm:$0xff]  ;;  %v431_v42 = vld [vmem:[%s2796_s28 + $0xa0] sm:$0xff] }
  0x76   : > { %492 = vperm.xlu1 %2263, %v470_v26   ;;  %v432_v43 = vld [vmem:[%s2796_s28 + $0xa8] sm:$0xff]  ;;  %v445_v44 = vpack.c.bf16 %v416_v41, %v415_v40  ;;  %v413_v46 = vld [vmem:[%s2796_s28 + $0x10] sm:$0xff]  ;;  %v414_v47 = vld [vmem:[%s2796_s28 + $0x18] sm:$0xff] }
  0x77   : > { %1980 = vmatpush3.bf16.xpose.msra.mxu0 %v2820_v9  ;;  %482 = vperm.xlu0 %2262, %v468_v28   ;;  %v453_v45 = vpack.c.bf16 %v432_v43, %v431_v42  ;;  %v429_v48 = vld [vmem:[%s2796_s28 + $0x90] sm:$0xff]  ;;  %v430_v49 = vld [vmem:[%s2796_s28 + $0x98] sm:$0xff]  ;;  %v444_v50 = vpack.c.bf16 %v414_v47, %v413_v46  ;;  %v411_v52 = vld [vmem:[%s2796_s28] sm:$0xff] }
  0x78   : > { %2004 = vmatpush3.bf16.xpose.msra.mxu1 %v2825_v12  ;;  %1981 = vmatprep.subr.bf16.mxu0 %v2836_v17  ;;  %v452_v51 = vpack.c.bf16 %v430_v49, %v429_v48  ;;  %v412_v53 = vld [vmem:[%s2796_s28 + $0x8] sm:$0xff]  ;;  %v427_v54 = vld [vmem:[%s2796_s28 + $0x80] sm:$0xff]  ;;  %v2266_v59 = vld [vmem:[#allocation6 + $0x10] sm:$0xff]  }
  0x79   : > { %2005 = vmatprep.subr.bf16.mxu1 %v2838_v18  ;;  %v428_v55 = vld [vmem:[%s2796_s28 + $0x88] sm:$0xff]  ;;  %v443_v56 = vpack.c.bf16 %v412_v53, %v411_v52  ;;  %v2267_v60 = vld [vmem:[#allocation6 + $0x18] sm:$0xff]   ;;  %s1815_s28 = sshll.u32 %s2792_s3, 5 }
  0x7a   : > { %502 = vperm.xlu1 %2263, %v472_v30   ;;  %v451_v57 = vpack.c.bf16 %v428_v55, %v427_v54  ;;  %v2265_v58 = vld [vmem:[#allocation6 + $0x8] sm:$0xff]   ;;  %s3013_s23 = scalar_lea.vmem [#allocation12], %s1815_s28 }
  0x7b   : > { %497 = vperm.xlu0 %2262, %v471_v31   ;;  %s1666_s4 = sshll.u32 %s3013_s23, 4  ;;  %s3059_s4 = int_to_ptr.vmem [resolvable:$true] %s1666_s4 }
  0x7c   : > { %s2478_s18 = scalar_lea.vmem %s3059_s4, 512  ;;  %p2485_p5 = scmp.lt.s32.totalorder %s3059_s4, %s2483_s25 }
  0x7d   : > { %p2479_p7 = scmp.ne.s32.totalorder %s3059_s4, %s2478_s18 }
  0x7e   : > { %512 = vperm.xlu1 %2263, %v474_v36  }
  0x7f   : > { %1982 = vmatpush3.bf16.xpose.msra.mxu0 %v2836_v17  ;;  %507 = vperm.xlu0 %2262, %v473_v37   ;;  %p2480_p13 = pnand %p2479_p7, %p3179_p12 }
  0x80   : > { %2006 = vmatpush3.bf16.xpose.msra.mxu1 %v2838_v18  ;;  %1983 = vmatprep.subr.bf16.mxu0 %v2857_v27 }
  0x81   : > { %2007 = vmatprep.subr.bf16.mxu1 %v2862_v29  ;;  %p2481_p0 = pneg %p2480_p13 }
  0x87   : > { %1984 = vmatpush3.bf16.xpose.msra.mxu0 %v2857_v27 }
  0x88   : > { %2008 = vmatpush3.bf16.xpose.msra.mxu1 %v2862_v29  ;;  %1985 = vmatprep.subr.bf16.mxu0 %v2884_v38 }
  0x89   : > { %2009 = vmatprep.subr.bf16.mxu1 %v2886_v39 }
  0x8f   : > { %1986 = vmatpush3.bf16.xpose.msra.mxu0 %v2884_v38 }
  0x90   : > { %2010 = vmatpush3.bf16.xpose.msra.mxu1 %v2886_v39  ;;  %1987 = vmatprep.subr.bf16.mxu0 %v445_v44 }
  0x91   : > { %2011 = vmatprep.subr.bf16.mxu1 %v453_v45 }
  0x97   : > { %1988 = vmatpush3.bf16.xpose.msra.mxu0 %v445_v44 }
  0x98   : > { %2012 = vmatpush3.bf16.xpose.msra.mxu1 %v453_v45  ;;  %1989 = vmatprep.subr.bf16.mxu0 %v444_v50 }
  0x99   : > { %2013 = vmatprep.subr.bf16.mxu1 %v452_v51 }
  0x9f   : > { %1990 = vmatpush3.bf16.xpose.msra.mxu0 %v444_v50 }
  0xa0   : > { %2014 = vmatpush3.bf16.xpose.msra.mxu1 %v452_v51  ;;  %1991 = vmatprep.subr.bf16.mxu0 %v443_v56 }
  0xa1   : > { %2015 = vmatprep.subr.bf16.mxu1 %v451_v57 }
  0xa7   : > { %1992 = vmatpush3.bf16.xpose.msra.mxu0 %v443_v56 }
  0xa8   : > { %2016 = vmatpush3.bf16.xpose.msra.mxu1 %v451_v57  ;;  %2025 = vmatprep.subr.bf16.mxu0 %v2813_v4 }
  0xa9   : > { %2049 = vmatprep.subr.bf16.mxu1 %v2818_v8 }
  0xae   : > { %1994 = vmatmul.mubr.bf16.vlgmr.msra.gmra.mxu0 %v2265_v58 }
  0xaf   : > { %2018 = vmatmul.mubr.bf16.vlgmr.msra.gmra.mxu1 %v2265_v58  ;;  %1997 = vmatprep.mubr.bf16.mxu0 %v2266_v59 }
  0xb0   : > { %2021 = vmatprep.mubr.bf16.mxu1 %v2266_v59  ;;  %2026 = vmatpush3.bf16.msra.mxu0 %v2813_v4 }
  0xb1   : > { %2027 = vmatprep.subr.bf16.mxu0 %v2820_v9  ;;  %2050 = vmatpush3.bf16.msra.mxu1 %v2818_v8 }
  0xb2   : > { %2051 = vmatprep.subr.bf16.mxu1 %v2825_v12 }
  0xb4   : > { %2028 = vmatpush3.bf16.msra.mxu0 %v2820_v9 }
  0xb5   : > { %2029 = vmatprep.subr.bf16.mxu0 %v2836_v17  ;;  %2052 = vmatpush3.bf16.msra.mxu1 %v2825_v12 }
  0xb6   : > { %1998 = vmatmul.mubr.bf16.gmra.mxu0 %v2267_v60  ;;  %2053 = vmatprep.subr.bf16.mxu1 %v2838_v18 }
  0xb7   : > { %2022 = vmatmul.mubr.bf16.gmra.mxu1 %v2267_v60 }
  0xb8   : > { %2030 = vmatpush3.bf16.msra.mxu0 %v2836_v17 }
  0xb9   : > { %2031 = vmatprep.subr.bf16.mxu0 %v2857_v27  ;;  %2054 = vmatpush3.bf16.msra.mxu1 %v2838_v18 }
  0xba   : > { %2055 = vmatprep.subr.bf16.mxu1 %v2862_v29 }
  0xbc   : > { %2032 = vmatpush3.bf16.msra.mxu0 %v2857_v27 }
  0xbd   : > { %2033 = vmatprep.subr.bf16.mxu0 %v2884_v38  ;;  %2056 = vmatpush3.bf16.msra.mxu1 %v2862_v29 }
  0xbe   : > { %2057 = vmatprep.subr.bf16.mxu1 %v2886_v39 }
  0xc0   : > { %2034 = vmatpush3.bf16.msra.mxu0 %v2884_v38 }
  0xc1   : > { %2035 = vmatprep.subr.bf16.mxu0 %v445_v44  ;;  %2058 = vmatpush3.bf16.msra.mxu1 %v2886_v39 }
  0xc2   : > { %2059 = vmatprep.subr.bf16.mxu1 %v453_v45 }
  0xc4   : > { %2036 = vmatpush3.bf16.msra.mxu0 %v445_v44 }
  0xc5   : > { %2037 = vmatprep.subr.bf16.mxu0 %v444_v50  ;;  %2060 = vmatpush3.bf16.msra.mxu1 %v453_v45 }
  0xc6   : > { %2061 = vmatprep.subr.bf16.mxu1 %v452_v51 }
  0xc8   : > { %2038 = vmatpush3.bf16.msra.mxu0 %v444_v50 }
  0xc9   : > { %2039 = vmatprep.subr.bf16.mxu0 %v443_v56  ;;  %2062 = vmatpush3.bf16.msra.mxu1 %v452_v51 }
  0xca   : > { %2063 = vmatprep.subr.bf16.mxu1 %v451_v57 }
  0xcc   : > { %2040 = vmatpush3.bf16.msra.mxu0 %v443_v56 }
  0xcd   : > { %2064 = vmatpush3.bf16.msra.mxu1 %v451_v57 }
  0xed   : > { %v488_v62 = vpop.permute.xlu1 %487 }
  0xee   : > { %v478_v61 = vpop.permute.xlu0 %477 }
  0xf1   : > { %v493_v10 = vpop.permute.xlu1 %492 }
  0xf2   : > { %v483_v3 = vpop.permute.xlu0 %482 }
  0xf5   : > { %v503_v17 = vpop.permute.xlu1 %502 }
  0xf6   : > { %v498_v12 = vpop.permute.xlu0 %497 }
  0xf9   : > { %v513_v26 = vpop.permute.xlu1 %512 }
  0xfa   : > { %v508_v21 = vpop.permute.xlu0 %507 }
 0x16e   : > { %v1995_v63 = vpop.f32.mrf.mxu0 }
 0x16f   : > { %v582_v0 = vadd.f32 %v1995_v63, %v488_v62  ;;  %v2019_v1 = vpop.f32.mrf.mxu1 }
 0x170   : > { %v573_v2 = vpop.f32.mrf.mxu0  ;;  %v647_v16 = vadd.f32 %v2019_v1, %v488_v62 }
 0x171   : > { %v638_v4 = vpop.f32.mrf.mxu1  ;;  %673 = vmax.xlane.f32.xlu0 %v582_v0  ;;  %v574_v7 = vadd.f32 %v573_v2, %v478_v61 }
 0x172   : > { %v639_v5 = vadd.f32 %v638_v4, %v478_v61  ;;  %v1996_v6 = vpop.f32.mrf.mxu0 }
 0x173   : > { %v2020_v8 = vpop.f32.mrf.mxu1  ;;  %v585_v13 = vadd.f32 %v1996_v6, %v493_v10 }
 0x174   : > { %685 = vmax.xlane.f32.xlu1 %v639_v5  ;;  %v576_v9 = vpop.f32.mrf.mxu0  ;;  %v650_v23 = vadd.f32 %v2020_v8, %v493_v10 }
 0x175   : > { %v577_v11 = vadd.f32 %v576_v9, %v483_v3  ;;  %669 = vmax.xlane.f32.xlu0 %v574_v7  ;;  %v641_v14 = vpop.f32.mrf.mxu1 }
 0x176   : > { %v1999_v15 = vpop.f32.mrf.mxu0  ;;  %v642_v18 = vadd.f32 %v641_v14, %v483_v3 }
 0x177   : > { %v2023_v19 = vpop.f32.mrf.mxu1  ;;  %v598_v22 = vadd.f32 %v1999_v15, %v508_v21 }
 0x178   : > { %671 = vmax.xlane.f32.xlu1 %v577_v11  ;;  %v589_v20 = vpop.f32.mrf.mxu0  ;;  %v2932_v34 = vadd.f32 %v2023_v19, %v508_v21 }
 0x179   : > { %675 = vmax.xlane.f32.xlu0 %v585_v13  ;;  %v654_v24 = vpop.f32.mrf.mxu1  ;;  %v590_v27 = vadd.f32 %v589_v20, %v498_v12 }
 0x17a   : > { %v2000_v25 = vpop.f32.mrf.mxu0  ;;  %v2926_v31 = vadd.f32 %v654_v24, %v498_v12 }
 0x17b   : > { %v601_v28 = vadd.f32 %v2000_v25, %v513_v26  ;;  %v2024_v29 = vpop.f32.mrf.mxu1 }
 0x17c   : > { %689 = vmax.xlane.f32.xlu1 %v647_v16  ;;  %v592_v30 = vpop.f32.mrf.mxu0  ;;  %v2938_v36 = vadd.f32 %v2024_v29, %v513_v26 }
 0x17d   : > { %687 = vmax.xlane.f32.xlu0 %v642_v18  ;;  %v2928_v32 = vadd.f32 %v592_v30, %v503_v17  ;;  %v657_v33 = vpop.f32.mrf.mxu1 }
 0x17e   : > { %v2934_v35 = vadd.f32 %v657_v33, %v503_v17 }
 0x180   : > { %681 = vmax.xlane.f32.xlu1 %v598_v22 }
 0x181   : > { %691 = vmax.xlane.f32.xlu0 %v650_v23 }
 0x184   : > { %677 = vmax.xlane.f32.xlu1 %v590_v27 }
 0x185   : > { %683 = vmax.xlane.f32.xlu0 %v601_v28 }
 0x188   : > { %693 = vmax.xlane.f32.xlu1 %v2926_v31 }
 0x189   : > { %679 = vmax.xlane.f32.xlu0 %v2928_v32 }
 0x18c   : > { %697 = vmax.xlane.f32.xlu1 %v2932_v34 }
 0x18d   : > { %695 = vmax.xlane.f32.xlu0 %v2934_v35 }
 0x191   : > { %699 = vmax.xlane.f32.xlu0 %v2938_v36 }
 0x1fa   : > { %v674_v37 = vpop.xlane.xlu0 %673 }
 0x1fb   : > { %v703_v38 = vsub.f32 %v582_v0, %v674_v37  ;;  %v2994_v37 = vld [vmem:[#allocation9 + $0x78] sm:$0xff]  }
 0x1fc   : > { %2093 = vmatprep.subr.bf16.mxu1 %v2994_v37 }
 0x1fd   : > { %v721_v39 = vmul.f32 1.442695, %v703_v38  ;;  %v686_v40 = vpop.xlane.xlu1 %685  ;;  %v2269_v38 = vld [vmem:[#allocation9 + $0x38] sm:$0xff]  }
 0x1fe   : > { %v709_v41 = vsub.f32 %v639_v5, %v686_v40  ;;  %v670_v42 = vpop.xlane.xlu0 %669  ;;  %2073 = vmatprep.subr.bf16.mxu0 %v2269_v38 }
 0x1ff   : > { %2308 = vpow2.f32 %v721_v39  ;;  %v701_v43 = vsub.f32 %v574_v7, %v670_v42 }
 0x200   : > { %v733_v46 = vmul.f32 1.442695, %v709_v41 }
 0x201   : > { %v717_v44 = vmul.f32 1.442695, %v701_v43  ;;  %v672_v45 = vpop.xlane.xlu1 %671 }
 0x202   : > { %v702_v47 = vsub.f32 %v577_v11, %v672_v45  ;;  %v676_v48 = vpop.xlane.xlu0 %675 }
 0x203   : > { %2310 = vpow2.f32 %v717_v44  ;;  %v704_v49 = vsub.f32 %v585_v13, %v676_v48 }
 0x204   : > { %2312 = vpow2.f32 %v733_v46  ;;  %v719_v52 = vmul.f32 1.442695, %v702_v47 }
 0x205   : > { %v723_v50 = vmul.f32 1.442695, %v704_v49  ;;  %v690_v51 = vpop.xlane.xlu1 %689 }
 0x206   : > { %v711_v53 = vsub.f32 %v647_v16, %v690_v51  ;;  %v688_v54 = vpop.xlane.xlu0 %687 }
 0x207   : > { %2314 = vpow2.f32 %v723_v50  ;;  %v710_v55 = vsub.f32 %v642_v18, %v688_v54 }
 0x208   : > { %v737_v56 = vmul.f32 1.442695, %v711_v53  ;;  %2316 = vpow2.f32 %v719_v52 }
 0x209   : > { %v682_v57 = vpop.xlane.xlu1 %681  ;;  %v735_v58 = vmul.f32 1.442695, %v710_v55 }
 0x20a   : > { %v707_v59 = vsub.f32 %v598_v22, %v682_v57  ;;  %v692_v60 = vpop.xlane.xlu0 %691  ;;  %2318 = vpow2.f32 %v737_v56 }
 0x20b   : > { %v712_v61 = vsub.f32 %v650_v23, %v692_v60  ;;  %2320 = vpow2.f32 %v735_v58 }
 0x20c   : > { %v2941_v62 = vpop.eup %2308  ;;  %v729_v63 = vmul.f32 1.442695, %v707_v59 }
 0x20d   : > { %v678_v0 = vpop.xlane.xlu1 %677  ;;  %753 = vadd.xlane.f32.xlu1 %v2941_v62  ;;  %v739_v1 = vmul.f32 1.442695, %v712_v61 }
 0x20e   : > { %v705_v2 = vsub.f32 %v590_v27, %v678_v0  ;;  %v684_v3 = vpop.xlane.xlu0 %683  ;;  %2322 = vpow2.f32 %v729_v63 }
 0x20f   : > { %v708_v4 = vsub.f32 %v601_v28, %v684_v3  ;;  %2324 = vpow2.f32 %v739_v1 }
 0x210   : > { %v2944_v5 = vpop.eup %2310  ;;  %v725_v6 = vmul.f32 1.442695, %v705_v2  ;;  %v2271_v2 = vld [vmem:[#allocation9 + $0x30] sm:$0xff]  }
 0x211   : > { %v694_v7 = vpop.xlane.xlu1 %693  ;;  %749 = vadd.xlane.f32.xlu1 %v2944_v5  ;;  %v731_v8 = vmul.f32 1.442695, %v708_v4  ;;  %v2948_v11 = vpop.eup %2312 }
 0x212   : > { %v713_v9 = vsub.f32 %v2926_v31, %v694_v7  ;;  %v680_v10 = vpop.xlane.xlu0 %679  ;;  %2326 = vpow2.f32 %v725_v6 }
 0x213   : > { %v706_v12 = vsub.f32 %v2928_v32, %v680_v10  ;;  %2328 = vpow2.f32 %v731_v8 }
 0x214   : > { %v2951_v13 = vpop.eup %2314  ;;  %v741_v14 = vmul.f32 1.442695, %v713_v9 }
 0x215   : > { %v698_v15 = vpop.xlane.xlu1 %697  ;;  %765 = vadd.xlane.f32.xlu1 %v2948_v11  ;;  %755 = vadd.xlane.f32.xlu0 %v2951_v13  ;;  %v727_v16 = vmul.f32 1.442695, %v706_v12  ;;  %v2956_v19 = vpop.eup %2316 }
 0x216   : > { %v715_v17 = vsub.f32 %v2932_v34, %v698_v15  ;;  %v696_v18 = vpop.xlane.xlu0 %695  ;;  %2330 = vpow2.f32 %v741_v14 }
 0x217   : > { %v714_v20 = vsub.f32 %v2934_v35, %v696_v18  ;;  %v2959_v21 = vpop.eup %2318  ;;  %2332 = vpow2.f32 %v727_v16 }
 0x218   : > { %v745_v22 = vmul.f32 1.442695, %v715_v17  ;;  %v2963_v24 = vpop.eup %2320 }
 0x219   : > { %769 = vadd.xlane.f32.xlu1 %v2959_v21  ;;  %751 = vadd.xlane.f32.xlu0 %v2956_v19  ;;  %v743_v25 = vmul.f32 1.442695, %v714_v20  ;;  %v2270_v20 = vld [vmem:[#allocation9 + $0x70] sm:$0xff]  }
 0x21a   : > { %v700_v23 = vpop.xlane.xlu0 %699  ;;  %2334 = vpow2.f32 %v745_v22 }
 0x21b   : > { %v716_v26 = vsub.f32 %v2938_v36, %v700_v23  ;;  %v2966_v27 = vpop.eup %2322  ;;  %2336 = vpow2.f32 %v743_v25 }
 0x21c   : > { %v2970_v28 = vpop.eup %2324 }
 0x21d   : > { %761 = vadd.xlane.f32.xlu1 %v2966_v27  ;;  %767 = vadd.xlane.f32.xlu0 %v2963_v24  ;;  %v747_v29 = vmul.f32 1.442695, %v716_v26 }
 0x21f   : > { %v2972_v30 = vpop.eup %2326  ;;  %2338 = vpow2.f32 %v747_v29  ;;  %v2272_v29 = vld [vmem:[#allocation9 + $0x68] sm:$0xff]  }
 0x220   : > { %v2976_v31 = vpop.eup %2328 }
 0x221   : > { %757 = vadd.xlane.f32.xlu1 %v2972_v30  ;;  %771 = vadd.xlane.f32.xlu0 %v2970_v28 }
 0x223   : > { %v2978_v32 = vpop.eup %2330 }
 0x224   : > { %v2982_v33 = vpop.eup %2332 }
 0x225   : > { %773 = vadd.xlane.f32.xlu1 %v2978_v32  ;;  %763 = vadd.xlane.f32.xlu0 %v2976_v31 }
 0x227   : > { %v2984_v34 = vpop.eup %2334 }
 0x228   : > { %v2988_v35 = vpop.eup %2336 }
 0x229   : > { %777 = vadd.xlane.f32.xlu1 %v2984_v34  ;;  %759 = vadd.xlane.f32.xlu0 %v2982_v33 }
 0x22c   : > { %v2991_v36 = vpop.eup %2338 }
 0x22d   : > { %775 = vadd.xlane.f32.xlu0 %v2988_v35 }
 0x231   : > { %779 = vadd.xlane.f32.xlu0 %v2991_v36 }
 0x296   : > { %v754_v39 = vpop.xlane.xlu1 %753 }
 0x29a   : > { %v750_v40 = vpop.xlane.xlu1 %749 }
 0x29e   : > { %v766_v41 = vpop.xlane.xlu1 %765  ;;  %v756_v42 = vpop.xlane.xlu0 %755 }
 0x29f   : > { %2340 = vrcp.f32 %v756_v42 }
 0x2a0   : > { %2342 = vrcp.f32 %v750_v40 }
 0x2a1   : > { %2344 = vrcp.f32 %v754_v39  ;;  %v2277_v39 = vld [vmem:[#allocation9 + $0x18] sm:$0xff]  }
 0x2a2   : > { %v770_v43 = vpop.xlane.xlu1 %769  ;;  %v752_v44 = vpop.xlane.xlu0 %751 }
 0x2a3   : > { %2346 = vrcp.f32 %v752_v44 }
 0x2a4   : > { %2348 = vrcp.f32 %v766_v41 }
 0x2a6   : > { %v762_v45 = vpop.xlane.xlu1 %761  ;;  %v768_v46 = vpop.xlane.xlu0 %767 }
 0x2a7   : > { %2350 = vrcp.f32 %v768_v46 }
 0x2a8   : > { %2352 = vrcp.f32 %v770_v43 }
 0x2a9   : > { %2354 = vrcp.f32 %v762_v45 }
 0x2aa   : > { %v758_v47 = vpop.xlane.xlu1 %757  ;;  %v772_v48 = vpop.xlane.xlu0 %771 }
 0x2ab   : > { %2356 = vrcp.f32 %v758_v47 }
 0x2ac   : > { %2358 = vrcp.f32 %v772_v48  ;;  %v2341_v49 = vpop.eup %2340 }
 0x2ad   : > { %v2343_v52 = vpop.eup %2342  ;;  %v800_v55 = vmul.f32 %v2341_v49, %v2951_v13  ;;  %v2273_v13 = vld [vmem:[#allocation9 + $0x28] sm:$0xff]  }
 0x2ae   : > { %v774_v50 = vpop.xlane.xlu1 %773  ;;  %v764_v51 = vpop.xlane.xlu0 %763  ;;  %v797_v58 = vmul.f32 %v2343_v52, %v2944_v5 }
 0x2af   : > { %2360 = vrcp.f32 %v774_v50  ;;  %v2345_v53 = vpop.eup %2344 }
 0x2b0   : > { %v2347_v54 = vpop.eup %2346  ;;  %2362 = vrcp.f32 %v764_v51  ;;  %v799_v61 = vmul.f32 %v2345_v53, %v2941_v62  ;;  %v2276_v51 = vld [vmem:[#allocation9 + $0x58] sm:$0xff]  }
 0x2b1   : > { %v798_v59 = vmul.f32 %v2347_v54, %v2956_v19  ;;  %v2349_v60 = vpop.eup %2348 }
 0x2b2   : > { %v778_v56 = vpop.xlane.xlu1 %777  ;;  %v760_v57 = vpop.xlane.xlu0 %759  ;;  %v834_v1 = vpack.c.bf16 %v800_v55, %v799_v61  ;;  %v805_v6 = vmul.f32 %v2349_v60, %v2948_v11  ;;  %v813_v10 = vadd.f32 %v799_v61, %v797_v58  ;;  %v2283_v60 = vld [vmem:[#allocation9] sm:$0xff]   ;;  %v2284_v61 = vld [vmem:[#allocation9 + $0xf8] sm:$0xff]  }
 0x2b3   : > { %2364 = vrcp.f32 %v778_v56  ;;  %v833_v63 = vpack.c.bf16 %v798_v59, %v797_v58  ;;  %v816_v40 = vadd.f32 %v800_v55, %v798_v59  ;;  %v2278_v56 = vld [vmem:[#allocation9 + $0x50] sm:$0xff]   ;;  %v2280_v58 = vld [vmem:[#allocation9 + $0x48] sm:$0xff]  }
 0x2b4   : > { %2366 = vrcp.f32 %v760_v57  ;;  %v2351_v0 = vpop.eup %2350  ;;  %v2279_v57 = vld [vmem:[#allocation9 + $0x10] sm:$0xff]   ;;  %v2281_v59 = vld [vmem:[#allocation9 + $0x8] sm:$0xff]  }
 0x2b5   : > { %v2353_v3 = vpop.eup %2352  ;;  %2041 = vmatprep.mubr.bf16.mxu0 %v833_v63  ;;  %v806_v7 = vmul.f32 %v2351_v0, %v2963_v24  ;;  %v2275_v24 = vld [vmem:[#allocation9 + $0x20] sm:$0xff]   ;;  %v2285_v63 = vld [vmem:[#allocation9 + $0xb8] sm:$0xff]  }
 0x2b6   : > { %v776_v4 = vpop.xlane.xlu0 %775  ;;  %v2355_v8 = vpop.eup %2354  ;;  %2042 = vmatmul.mubr.bf16.vlgmr.msra.gmra.mxu0 %v834_v1  ;;  %v807_v14 = vmul.f32 %v2353_v3, %v2959_v21 }
 0x2b7   : > { %2368 = vrcp.f32 %v776_v4  ;;  %v837_v9 = vpack.c.bf16 %v806_v7, %v805_v6  ;;  %2074 = vmatpush3.bf16.msra.mxu0 %v2269_v38  ;;  %v803_v17 = vmul.f32 %v2355_v8, %v2966_v27 }
 0x2b8   : > { %v2357_v5 = vpop.eup %2356  ;;  %2075 = vmatprep.subr.bf16.mxu0 %v2271_v2  ;;  %v819_v25 = vadd.f32 %v807_v14, %v805_v6 }
 0x2b9   : > { %v2359_v62 = vpop.eup %2358  ;;  %v801_v12 = vmul.f32 %v2357_v5, %v2972_v30  ;;  %2065 = vmatprep.mubr.bf16.mxu1 %v837_v9 }
 0x2ba   : > { %v808_v15 = vmul.f32 %v2359_v62, %v2970_v28  ;;  %v780_v11 = vpop.xlane.xlu0 %779  ;;  %v2286_v62 = vld [vmem:[#allocation9 + $0xf0] sm:$0xff]  }
 0x2bb   : > { %2370 = vrcp.f32 %v780_v11  ;;  %v814_v16 = vadd.f32 %v813_v10, %v801_v12  ;;  %2076 = vmatpush3.bf16.msra.mxu0 %v2271_v2 }
 0x2bc   : > { %v2361_v18 = vpop.eup %2360  ;;  %v838_v19 = vpack.c.bf16 %v808_v15, %v807_v14  ;;  %2077 = vmatprep.subr.bf16.mxu0 %v2273_v13  ;;  %v822_v48 = vadd.f32 %v808_v15, %v806_v7  ;;  %v2288_v15 = vld [vmem:[#allocation9 + $0xe8] sm:$0xff]  }
 0x2bd   : > { %v815_v22 = vadd.f32 %v814_v16, %v803_v17  ;;  %v809_v23 = vmul.f32 %v2361_v18, %v2978_v32  ;;  %v2363_v21 = vpop.eup %2362  ;;  %v2289_v16 = vld [vmem:[#allocation9 + $0xa8] sm:$0xff]   ;;  %v2290_v18 = vld [vmem:[#allocation9 + $0xe0] sm:$0xff]  }
 0x2be   : > { %2066 = vmatmul.mubr.bf16.vlgmr.msra.gmra.mxu1 %v838_v19  ;;  %v804_v30 = vmul.f32 %v2363_v21, %v2976_v31  ;;  %v2274_v31 = vld [vmem:[#allocation9 + $0x60] sm:$0xff]   ;;  %v2293_v21 = vld [vmem:[#allocation9 + $0x98] sm:$0xff]  }
 0x2bf   : > { %v825_v26 = vmul.f32 0.25, %v815_v22  ;;  %2094 = vmatpush3.bf16.msra.mxu1 %v2994_v37  ;;  %2078 = vmatpush3.bf16.msra.mxu0 %v2273_v13  ;;  %v820_v32 = vadd.f32 %v819_v25, %v809_v23  ;;  %v2287_v13 = vld [vmem:[#allocation9 + $0xb0] sm:$0xff]   ;;  %v2291_v22 = vld [vmem:[#allocation9 + $0xa0] sm:$0xff]  }
 0x2c0   : > { %v2365_v28 = vpop.eup %2364  ;;  %2095 = vmatprep.subr.bf16.mxu1 %v2270_v20  ;;  %2079 = vmatprep.subr.bf16.mxu0 %v2275_v24  ;;  %v836_v45 = vpack.c.bf16 %v804_v30, %v803_v17  ;;  %v2294_v25 = vld [vmem:[#allocation9 + $0xd0] sm:$0xff]  }
 0x2c1   : > { %v2367_v27 = vpop.eup %2366  ;;  %829 = vst [vmem:[%s3013_s23] sm:$0xff] %v825_v26  ;;  %v811_v38 = vmul.f32 %v2365_v28, %v2984_v34  ;;  %v2295_v26 = vld [vmem:[#allocation9 + $0x90] sm:$0xff]  }
 0x2c2   : > { %v802_v37 = vmul.f32 %v2367_v27, %v2982_v33  ;;  %v2297_v27 = vld [vmem:[#allocation9 + $0x88] sm:$0xff]  }
 0x2c3   : > { %v821_v41 = vadd.f32 %v820_v32, %v811_v38  ;;  %2096 = vmatpush3.bf16.msra.mxu1 %v2270_v20  ;;  %2080 = vmatpush3.bf16.msra.mxu0 %v2275_v24  ;;  %v2292_v24 = vld [vmem:[#allocation9 + $0xd8] sm:$0xff]   ;;  %v2298_v32 = vld [vmem:[#allocation9 + $0xc0] sm:$0xff]  }
 0x2c4   : > { %v2369_v42 = vpop.eup %2368  ;;  %v817_v43 = vadd.f32 %v816_v40, %v802_v37  ;;  %v835_v44 = vpack.c.bf16 %v802_v37, %v801_v12  ;;  %2097 = vmatprep.subr.bf16.mxu1 %v2272_v29  ;;  %2081 = vmatprep.subr.bf16.mxu0 %v2277_v39 }
 0x2c5   : > { %v810_v46 = vmul.f32 %v2369_v42, %v2988_v35  ;;  %v827_v47 = vmul.f32 0.25, %v821_v41  ;;  %v2300_v42 = vld [vmem:[%s3149_s6 + $0x38] sm:$0xff]  }
 0x2c6   : > { %2045 = vmatprep.mubr.bf16.mxu0 %v835_v44  ;;  %v818_v34 = vadd.f32 %v817_v43, %v804_v30  ;;  %v2301_v43 = vld [vmem:[%s3149_s6 + $0x30] sm:$0xff]   ;;  %v2302_v44 = vld [vmem:[%s3149_s6 + $0x28] sm:$0xff]  }
 0x2c7   : > { %2046 = vmatmul.mubr.bf16.gmra.mxu0 %v836_v45  ;;  %v839_v33 = vpack.c.bf16 %v810_v46, %v809_v23  ;;  %831 = vst [vmem:[%s3013_s23 + $0x10] sm:$0xff] %v827_v47  ;;  %2098 = vmatpush3.bf16.msra.mxu1 %v2272_v29  ;;  %v823_v52 = vadd.f32 %v822_v48, %v810_v46  ;;  %v2296_v29 = vld [vmem:[#allocation9 + $0xc8] sm:$0xff]   ;;  %v2305_v46 = vld [vmem:[%s3149_s6 + $0x10] sm:$0xff]   ;;  %v2306_v47 = vld [vmem:[%s3149_s6 + $0x8] sm:$0xff]  }
 0x2c8   : > { %v2371_v49 = vpop.eup %2370  ;;  %v826_v50 = vmul.f32 0.25, %v818_v34  ;;  %2099 = vmatprep.subr.bf16.mxu1 %v2274_v31  ;;  %2082 = vmatpush3.bf16.msra.mxu0 %v2277_v39  ;;  %v2304_v45 = vld [vmem:[%s3149_s6 + $0x18] sm:$0xff]   ;;  %v2307_v34 = vld [vmem:[%s3149_s6] sm:$0xff]  }
 0x2c9   : > { %2069 = vmatprep.mubr.bf16.mxu1 %v839_v33  ;;  %v812_v35 = vmul.f32 %v2371_v49, %v2991_v36  ;;  %2083 = vmatprep.subr.bf16.mxu0 %v2279_v57  ;;  %v2282_v36 = vld [vmem:[#allocation9 + $0x40] sm:$0xff]  }
 0x2ca   : > { %830 = vst [vmem:[%s3013_s23 + $0x8] sm:$0xff] %v826_v50 }
 0x2cb   : > { %v824_v53 = vadd.f32 %v823_v52, %v812_v35  ;;  %v840_v54 = vpack.c.bf16 %v812_v35, %v811_v38  ;;  %2100 = vmatpush3.bf16.msra.mxu1 %v2274_v31  ;;  %v2299_v38 = vld [vmem:[#allocation9 + $0x80] sm:$0xff]   ;;  %v2303_v31 = vld [vmem:[%s3149_s6 + $0x20] sm:$0xff]  }
 0x2cc   : > { %2101 = vmatprep.subr.bf16.mxu1 %v2276_v51  ;;  %2084 = vmatpush3.bf16.msra.mxu0 %v2279_v57 }
 0x2cd   : > { %v828_v55 = vmul.f32 0.25, %v824_v53  ;;  %2070 = vmatmul.mubr.bf16.gmra.mxu1 %v840_v54  ;;  %2085 = vmatprep.subr.bf16.mxu0 %v2281_v59 }
 0x2cf   : > { %832 = vst [vmem:[%s3013_s23 + $0x18] sm:$0xff] %v828_v55  ;;  %2102 = vmatpush3.bf16.msra.mxu1 %v2276_v51  ;;  %s2484_s23 = scalar_lea.vmem %s2483_s25, 1024 }
 0x2d0   : > { %2103 = vmatprep.subr.bf16.mxu1 %v2278_v56  ;;  %2086 = vmatpush3.bf16.msra.mxu0 %v2281_v59  ;;  %p2486_p10 = scmp.lt.s32.totalorder %s2484_s23, %s2478_s18 }
 0x2d1   : > { %2087 = vmatprep.subr.bf16.mxu0 %v2283_v60 }
 0x2d2   : > { %p2487_p2 = por %p2486_p10, %p2485_p5 }
 0x2d3   : > { %2104 = vmatpush3.bf16.msra.mxu1 %v2278_v56 }
 0x2d4   : > { %2105 = vmatprep.subr.bf16.mxu1 %v2280_v58  ;;  %2088 = vmatpush3.bf16.msra.mxu0 %v2283_v60  ;;  %p2488_p9 = pnand %p2487_p2, %p2481_p0 }
 0x2d5   : > { %2113 = vmatprep.subr.bf16.mxu0 %v2285_v63 }
 0x2d7   : > { %2106 = vmatpush3.bf16.msra.mxu1 %v2280_v58 }
 0x2d8   : > { %2107 = vmatprep.subr.bf16.mxu1 %v2282_v36 }
 0x2db   : > { %2108 = vmatpush3.bf16.msra.mxu1 %v2282_v36 }
 0x2dc   : > { %2133 = vmatprep.subr.bf16.mxu1 %v2284_v61 }
 0x376   : > { %v2043_v0 = vpop.f32.mrf.mxu0 }
 0x378   : > { %v875_v1 = vpop.f32.mrf.mxu0 }
 0x37a   : > { %v2044_v2 = vpop.f32.mrf.mxu0 }
 0x37b   : > { %v972_v3 = vpack.c.bf16 %v2044_v2, %v2043_v0 }
 0x37c   : > { %v878_v4 = vpop.f32.mrf.mxu0 }
 0x37d   : > { %v971_v6 = vpack.c.bf16 %v878_v4, %v875_v1  ;;  %2109 = vmatprep.mubr.bf16.mxu1 %v972_v3 }
 0x37e   : > { %v2067_v7 = vpop.f32.mrf.mxu1 }
 0x37f   : > { %2089 = vmatprep.mubr.bf16.mxu0 %v971_v6 }
 0x380   : > { %v940_v8 = vpop.f32.mrf.mxu1 }
 0x382   : > { %v2068_v5 = vpop.f32.mrf.mxu1 }
 0x383   : > { %v976_v9 = vpack.c.bf16 %v2068_v5, %v2067_v7  ;;  %v1853_v7 = vld [vmem:[%s3148_s5] ss:$0 sm:$0xff] }
 0x384   : > { %v943_v10 = vpop.f32.mrf.mxu1 }
 0x385   : > { %v975_v12 = vpack.c.bf16 %v943_v10, %v940_v8  ;;  %2110 = vmatmul.mubr.bf16.vlgmr.msra.gmra.mxu1 %v976_v9 }
 0x386   : > { %2134 = vmatpush3.bf16.msra.mxu1 %v2284_v61 }
 0x387   : > { %v2047_v14 = vpop.f32.mrf.mxu0  ;;  %2090 = vmatmul.mubr.bf16.vlgmr.msra.gmra.mxu0 %v975_v12  ;;  %2135 = vmatprep.subr.bf16.mxu1 %v2286_v62  ;;  %v1490_v12 = vld [vmem:[#allocation8 + $0x8] sm:$0xff] }
 0x388   : > { %2114 = vmatpush3.bf16.msra.mxu0 %v2285_v63 }
 0x389   : > { %v891_v11 = vpop.f32.mrf.mxu0  ;;  %2115 = vmatprep.subr.bf16.mxu0 %v2287_v13 }
 0x38a   : > { %2136 = vmatpush3.bf16.msra.mxu1 %v2286_v62 }
 0x38b   : > { %v2048_v17 = vpop.f32.mrf.mxu0  ;;  %2137 = vmatprep.subr.bf16.mxu1 %v2288_v15 }
 0x38c   : > { %v974_v19 = vpack.c.bf16 %v2048_v17, %v2047_v14  ;;  %2116 = vmatpush3.bf16.msra.mxu0 %v2287_v13 }
 0x38d   : > { %v894_v20 = vpop.f32.mrf.mxu0  ;;  %2117 = vmatprep.subr.bf16.mxu0 %v2289_v16  ;;  %v2071_v28 = vpop.f32.mrf.mxu1 }
 0x38e   : > { %v973_v23 = vpack.c.bf16 %v894_v20, %v891_v11  ;;  %2138 = vmatpush3.bf16.msra.mxu1 %v2288_v15  ;;  %2149 = vmatprep.mubr.bf16.mxu1 %v974_v19  ;;  %v1489_v15 = vld [vmem:[#allocation8] sm:$0xff] }
 0x38f   : > { %2139 = vmatprep.subr.bf16.mxu1 %v2290_v18  ;;  %v956_v30 = vpop.f32.mrf.mxu1 }
 0x390   : > { %2118 = vmatpush3.bf16.msra.mxu0 %v2289_v16  ;;  %2129 = vmatprep.mubr.bf16.mxu0 %v973_v23 }
 0x391   : > { %2119 = vmatprep.subr.bf16.mxu0 %v2291_v22  ;;  %v2072_v39 = vpop.f32.mrf.mxu1 }
 0x392   : > { %2140 = vmatpush3.bf16.msra.mxu1 %v2290_v18  ;;  %v978_v37 = vpack.c.bf16 %v2072_v39, %v2071_v28 }
 0x393   : > { %2141 = vmatprep.subr.bf16.mxu1 %v2292_v24  ;;  %v959_v40 = vpop.f32.mrf.mxu1 }
 0x394   : > { %2120 = vmatpush3.bf16.msra.mxu0 %v2291_v22  ;;  %v977_v41 = vpack.c.bf16 %v959_v40, %v956_v30 }
 0x395   : > { %2121 = vmatprep.subr.bf16.mxu0 %v2293_v21 }
 0x396   : > { %2142 = vmatpush3.bf16.msra.mxu1 %v2292_v24 }
 0x397   : > { %2143 = vmatprep.subr.bf16.mxu1 %v2294_v25 }
 0x398   : > { %2122 = vmatpush3.bf16.msra.mxu0 %v2293_v21 }
 0x399   : > { %2123 = vmatprep.subr.bf16.mxu0 %v2295_v26 }
 0x39a   : > { %2144 = vmatpush3.bf16.msra.mxu1 %v2294_v25 }
 0x39b   : > { %2145 = vmatprep.subr.bf16.mxu1 %v2296_v29 }
 0x39c   : > { %2124 = vmatpush3.bf16.msra.mxu0 %v2295_v26 }
 0x39d   : > { %2125 = vmatprep.subr.bf16.mxu0 %v2297_v27 }
 0x39e   : > { %2146 = vmatpush3.bf16.msra.mxu1 %v2296_v29 }
 0x39f   : > { %2147 = vmatprep.subr.bf16.mxu1 %v2298_v32 }
 0x3a0   : > { %2126 = vmatpush3.bf16.msra.mxu0 %v2297_v27 }
 0x3a1   : > { %2127 = vmatprep.subr.bf16.mxu0 %v2299_v38 }
 0x3a2   : > { %2148 = vmatpush3.bf16.msra.mxu1 %v2298_v32 }
 0x3a4   : > { %2128 = vmatpush3.bf16.msra.mxu0 %v2299_v38 }
 0x3a5   : > { %2150 = vmatmul.mubr.bf16.vlgmr.msra.gmra.mxu1 %v978_v37  ;;  %2153 = vmatprep.subr.bf16.mxu0 %v2300_v42 }
 0x3a7   : > { %2130 = vmatmul.mubr.bf16.vlgmr.msra.gmra.mxu0 %v977_v41 }
 0x3a8   : > { %2154 = vmatpush3.bf16.msra.mxu0 %v2300_v42 }
 0x3a9   : > { %2155 = vmatprep.subr.bf16.mxu0 %v2301_v43 }
 0x3ac   : > { %2156 = vmatpush3.bf16.msra.mxu0 %v2301_v43 }
 0x3ad   : > { %2157 = vmatprep.subr.bf16.mxu0 %v2302_v44 }
 0x3b0   : > { %2158 = vmatpush3.bf16.msra.mxu0 %v2302_v44 }
 0x3b1   : > { %2159 = vmatprep.subr.bf16.mxu0 %v2303_v31 }
 0x3b4   : > { %2160 = vmatpush3.bf16.msra.mxu0 %v2303_v31 }
 0x3b5   : > { %2161 = vmatprep.subr.bf16.mxu0 %v2304_v45 }
 0x3b8   : > { %2162 = vmatpush3.bf16.msra.mxu0 %v2304_v45 }
 0x3b9   : > { %2163 = vmatprep.subr.bf16.mxu0 %v2305_v46 }
 0x3bc   : > { %2164 = vmatpush3.bf16.msra.mxu0 %v2305_v46 }
 0x3bd   : > { %2165 = vmatprep.subr.bf16.mxu0 %v2306_v47 }
 0x3c0   : > { %2166 = vmatpush3.bf16.msra.mxu0 %v2306_v47 }
 0x3c1   : > { %2167 = vmatprep.subr.bf16.mxu0 %v2307_v34 }
 0x3c4   : > { %2168 = vmatpush3.bf16.msra.mxu0 %v2307_v34 }
 0x445   : > { %v2111_v48 = vpop.f32.mrf.mxu1 }
 0x447   : > { %v2091_v33 = vpop.f32.mrf.mxu0  ;;  %v1199_v49 = vpop.f32.mrf.mxu1 }
 0x448   : > { %v1216_v55 = vadd.f32 %v2111_v48, %v2091_v33 }
 0x449   : > { %v1077_v50 = vpop.f32.mrf.mxu0  ;;  %v2112_v51 = vpop.f32.mrf.mxu1 }
 0x44a   : > { %v1214_v58 = vadd.f32 %v1199_v49, %v1077_v50 }
 0x44b   : > { %v2092_v52 = vpop.f32.mrf.mxu0  ;;  %v1202_v35 = vpop.f32.mrf.mxu1 }
 0x44c   : > { %v1217_v60 = vadd.f32 %v2112_v51, %v2092_v52 }
 0x44d   : > { %v1080_v53 = vpop.f32.mrf.mxu0 }
 0x44e   : > { %v1215_v1 = vadd.f32 %v1202_v35, %v1080_v53 }
 0x465   : > { %v2151_v54 = vpop.f32.mrf.mxu1 }
 0x467   : > { %v2131_v56 = vpop.f32.mrf.mxu0  ;;  %v1451_v57 = vpop.f32.mrf.mxu1 }
 0x468   : > { %v1342_v59 = vadd.f32 %v2131_v56, %v1216_v55 }
 0x469   : > { %v1325_v36 = vpop.f32.mrf.mxu0  ;;  %v2152_v63 = vpop.f32.mrf.mxu1 }
 0x46a   : > { %v1340_v61 = vadd.f32 %v1325_v36, %v1214_v58  ;;  %v1468_v4 = vadd.f32 %v2151_v54, %v1342_v59 }
 0x46b   : > { %v2132_v0 = vpop.f32.mrf.mxu0  ;;  %v1454_v9 = vpop.f32.mrf.mxu1 }
 0x46c   : > { %v1466_v2 = vadd.f32 %v1451_v57, %v1340_v61  ;;  %v1343_v3 = vadd.f32 %v2132_v0, %v1217_v60  ;;  %v1487_v14 = vadd.f32 %v1853_v7, %v1468_v4 }
 0x46d   : > { %v1328_v6 = vpop.f32.mrf.mxu0 }
 0x46e   : > { %v1469_v8 = vadd.f32 %v2152_v63, %v1343_v3  ;;  %v1341_v5 = vadd.f32 %v1328_v6, %v1215_v1  ;;  %v1485_v62 = vadd.f32 %v1853_v7, %v1466_v2  ;;  %v1493_v19 = vadd.f32 %v1489_v15, %v1487_v14 }
 0x470   : > { %v1488_v10 = vadd.f32 %v1853_v7, %v1469_v8  ;;  %v1467_v13 = vadd.f32 %v1454_v9, %v1341_v5  ;;  %v1491_v17 = vadd.f32 %v1489_v15, %v1485_v62 }
 0x472   : > { %v1486_v11 = vadd.f32 %v1853_v7, %v1467_v13  ;;  %v1494_v16 = vadd.f32 %v1490_v12, %v1488_v10 }
 0x474   : > { %v1492_v18 = vadd.f32 %v1490_v12, %v1486_v11  ;;  %v1496_v22 = vpack.c.bf16 %v1494_v16, %v1493_v19 }
 0x476   : > { %v1495_v20 = vpack.c.bf16 %v1492_v18, %v1491_v17 }
 0x478   : > { %2169 = vmatprep.mubr.bf16.mxu0 %v1495_v20 }
 0x479   : > { %2170 = vmatmul.mubr.bf16.vlgmr.msra.gmra.mxu0 %v1496_v22 }
 0x47a   : > { %2491 = shalt.err (!%p2488_p9)
}
 0x47b   : > { %s2492_s27 = scalar_lea.hbm %s3057_s17, 512  ;;  %s2496_s22 = scalar_lea.hbm %s3152_s9, 1024 }
 0x47c   : > { %p2493_p1 = scmp.ne.s32.totalorder %s3057_s17, %s2492_s27  ;;  %p2497_p8 = scmp.lt.s32.totalorder %s3057_s17, %s3152_s9 }
 0x47d   : > { %p2498_p3 = scmp.lt.s32.totalorder %s2496_s22, %s2492_s27 }
 0x47e   : > { %p2494_p4 = pnand %p2493_p1, %p3179_p12 }
 0x47f   : > { %p2499_p11 = por %p2498_p3, %p2497_p8 }
 0x480   : > { %p2495_p6 = pneg %p2494_p4 }
 0x482   : > { %p2500_p7 = pnand %p2499_p11, %p2495_p6 }
 0x484   : > { %2503 = shalt.err (!%p2500_p7)
}
 0x485   : > { %s2592_s18 = smov 128   ;;  %s2593_s25 = smov 8   ;;  %v1854_v23 = vld [vmem:[%s3150_s7] ss:$0 sm:$0xff] }
 0x486   : > { %2188 = dma.vmem_to_hbm [thread:$0]  (%p3179_p12), %s3059_s4, 512, %s3057_s17, %s1635_s24, %s2592_s18, %s2592_s18, %s2593_s25  }
 0x487   : > { %s399_s27 = scalar_lea.vmem [#allocation11], %s1815_s28  ;;  %s3099_s28 = scalar_lea.hbm %s3151_s8, %s1876_s14 }
 0x488   : > { %s1649_s4 = sshll.u32 %s399_s27, 4  ;;  %s1630_s1 = scalar_lea.sflag [#allocation5], %s2792_s3  ;;  %s3092_s4 = int_to_ptr.vmem [resolvable:$true] %s1649_s4 }
 0x489   : > { %s2504_s22 = scalar_lea.vmem %s3092_s4, 512  ;;  %s2594_s15 = smov [#allocation11]  }
 0x48a   : > { %p2505_p13 = scmp.ne.s32.totalorder %s3092_s4, %s2504_s22  ;;  %s2508_s20 = sshll.u32 %s2594_s15, 4  ;;  %s2509_s20 = int_to_ptr.vmem [resolvable:$false] %s2508_s20 }
 0x48b   : > { %s2510_s23 = scalar_lea.vmem %s2509_s20, 1024  ;;  %p2511_p10 = scmp.lt.s32.totalorder %s3092_s4, %s2509_s20 }
 0x48c   : > { %p2506_p0 = pnand %p2505_p13, %p3179_p12  ;;  %p2512_p2 = scmp.lt.s32.totalorder %s2510_s23, %s2504_s22 }
 0x48e   : > { %p2507_p5 = pneg %p2506_p0  ;;  %p2513_p9 = por %p2512_p2, %p2511_p10 }
 0x490   : > { %p2514_p1 = pnand %p2513_p9, %p2507_p5 }
 0x539   : > { %v2171_v24 = vpop.f32.mrf.mxu0 }
 0x53a   : > { %v1611_v21 = vadd.f32 %v2171_v24, %v1854_v23 }
 0x53b   : > { %v1602_v25 = vpop.f32.mrf.mxu0 }
 0x53c   : > { %v1619_v26 = vmax.f32 %v1611_v21, 0.0  ;;  %v1603_v28 = vadd.f32 %v1854_v23, %v1602_v25 }
 0x53d   : > { %v2172_v29 = vpop.f32.mrf.mxu0 }
 0x53e   : > { %v1623_v27 = vadd.f32 %v1619_v26, %v1493_v19  ;;  %v1617_v30 = vmax.f32 %v1603_v28, 0.0  ;;  %v1614_v32 = vadd.f32 %v2172_v29, %v1854_v23 }
 0x53f   : > { %v1605_v38 = vpop.f32.mrf.mxu0 }
 0x540   : > { %1627 = vst [vmem:[%s399_s27 + $0x10] sm:$0xff] %v1623_v27  ;;  %v1621_v39 = vadd.f32 %v1617_v30, %v1491_v17  ;;  %v1620_v40 = vmax.f32 %v1614_v32, 0.0  ;;  %v1606_v37 = vadd.f32 %v1854_v23, %v1605_v38 }
 0x542   : > { %1625 = vst [vmem:[%s399_s27] sm:$0xff] %v1621_v39  ;;  %v1624_v41 = vadd.f32 %v1620_v40, %v1494_v16  ;;  %v1618_v42 = vmax.f32 %v1606_v37, 0.0 }
 0x544   : > { %1628 = vst [vmem:[%s399_s27 + $0x18] sm:$0xff] %v1624_v41  ;;  %v1622_v43 = vadd.f32 %v1618_v42, %v1492_v18 }
 0x546   : > { %1626 = vst [vmem:[%s399_s27 + $0x8] sm:$0xff] %v1622_v43 }
 0x547   : > { %2517 = shalt.err (!%p2514_p1)
}
 0x548   : > { %s2518_s13 = scalar_lea.hbm %s3099_s28, 512  ;;  %s2522_s29 = scalar_lea.hbm %s3151_s8, 1024 }
 0x549   : > { %p2519_p4 = scmp.ne.s32.totalorder %s3099_s28, %s2518_s13  ;;  %p2523_p3 = scmp.lt.s32.totalorder %s3099_s28, %s3151_s8 }
 0x54a   : > { %p2524_p11 = scmp.lt.s32.totalorder %s2522_s29, %s2518_s13 }
 0x54b   : > { %p2520_p6 = pnand %p2519_p4, %p3179_p12 }
 0x54c   : > { %p2525_p7 = por %p2524_p11, %p2523_p3 }
 0x54d   : > { %p2521_p8 = pneg %p2520_p6 }
 0x54f   : > { %p2526_p13 = pnand %p2525_p7, %p2521_p8 }
 0x551   : > { %2529 = shalt.err (!%p2526_p13)
}
 0x552   : > { %2187 = dma.vmem_to_hbm [thread:$0]  (%p3179_p12), %s3092_s4, 512, %s3099_s28, %s1630_s1, %s2592_s18, %s2592_s18, %s2593_s25  }
 0x553 PF: > { %s1681_s24 = sand.u32 1, %s2568_s30   ;;  %p3180_p0 = scmp.ne.s32.totalorder %s3163_s16, 0 }
 0x554   : > { %p3181_p5 = scmp.ge.s32.totalorder %s2580_s12, 2  ;;  %s1682_s22 = scalar_lea.sflag [#allocation5], %s1681_s24 }
 0x556   : > { %p2206_p10 = pnand %p3181_p5, %p3180_p0 }
 0x558   : > { %p2207_p2 = pneg %p2206_p10 }
 0x55a   : > { %2559 = dma.done.wait (%p2207_p2), %s1682_s22, 512  }
 0x55b   : > { %2561 = vsyncadd (%p2207_p2), %s1682_s22, 4294966784  ;;  %s1691_s15 = scalar_lea.sflag [#allocation13], %s1681_s24 }
 0x55c   : > { %2563 = dma.done.wait (%p2207_p2), %s1691_s15, 512  }
 0x55d   : > { %2565 = vsyncadd (%p2207_p2), %s1691_s15, 4294966784  ;;  %p28_p12 = scmp.ge.s32.totalorder %s2723_s26, 4   ;;  %s3182_s30 = smov %s2572_s10 }
 0x55e   : > { %s3183_s10 = smov %s2576_s11  ;;  %s3184_s11 = smov %s2744_s19 }
 0x55f   : > { %s3185_s12 = smov %s2723_s26  ;;  %30 = sbr.rel (!%p28_p12) target bundleno = 13 (0xd), region = 129 }
 0x564   :  { %1696 = vsyncpa [#allocation4], 1 }
 0x565   :  { %1698 = vsyncpa [#allocation4 + $0x1], 1 }
 0x566   :  { %1699 = vsyncpa [#allocation7], 1 }
 0x567   :  { %1700 = vsyncpa [#allocation10], 1 }
 0x568   :  { %1701 = vsyncpa [#allocation5], 1 }
 0x569   :  { %1703 = vsyncpa [#allocation5 + $0x1], 1 }
 0x56a   :  { %1704 = vsyncpa [#allocation13], 1 }
 0x56b   :  { %1706 = vsyncpa [#allocation13 + $0x1], 1 }

</bundles_post_ra>
